<compile_context>
chip_gen: v7x
topology: tpu7x:2x2x1
jax: 0.10.0
libtpu: 0.0.40
codegen_flags: <defaults>
</compile_context>

<pallas_src>
import math

import jax
import jax.numpy as jnp
from jax.experimental import pallas as pl
from jax.experimental.pallas import tpu as pltpu


def _gelu(x):
    # PyTorch nn.GELU() default = exact erf formulation (kept for parity).
    return 0.5 * x * (1.0 + jax.lax.erf(x * 0.7071067811865476))


# ---------------------------------------------------------------------------
# Kernel 1: scores = min_max_norm(PredictorLG(cat(mean_N(x), max_N(x))))
# grid = (B // Bb, N // Nb): Bb batch elements per step (parallel axis),
# N tiled as a reduction axis (arbitrary, last) with running sum/max
# accumulators in VMEM scratch. All feature math runs on the last N tile on
# (Bb*T, .) row blocks. The two lane-dim concats of the PyTorch code are
# folded into split matmuls (mathematically identical).
# ---------------------------------------------------------------------------
def _make_score_kernel(n_total):
    inv_n = 1.0 / float(n_total)

    def kernel(x_ref, g_ref, beta_ref, w1_ref, b1_ref,
               w2_ref, b2_ref, w3_ref, b3_ref, w4_ref, b4_ref,
               out_ref, sum_sc, max_sc):
        n = pl.program_id(1)
        Bb, T, Nb, C = x_ref.shape
        D = 2 * C
        Dh = D // 2

        x = x_ref[...].reshape(Bb * T, Nb, C)      # collapse leading dims only

        # Partial 'tpool' pooling over this N tile.
        psum = jnp.sum(x, axis=1)                  # (Bb*T, C)
        pmax = jnp.max(x, axis=1)                  # (Bb*T, C)

        @pl.when(n == 0)
        def _():
            sum_sc[...] = psum
            max_sc[...] = pmax

        @pl.when(n != 0)
        def _():
            sum_sc[...] = sum_sc[...] + psum
            max_sc[...] = jnp.maximum(max_sc[...], pmax)

        # PredictorLG + min_max_norm only on the last N tile.
        @pl.when(n == pl.num_programs(1) - 1)
        def _():
            avg = sum_sc[...] * inv_n              # (Bb*T, C)
            mx = max_sc[...]                       # (Bb*T, C)

            # LayerNorm over the (virtual) concat [avg | mx] of width D = 2C.
            ssum = (jnp.sum(avg, axis=-1, keepdims=True)
                    + jnp.sum(mx, axis=-1, keepdims=True))
            mu = ssum / D
            sq = (jnp.sum((avg - mu) ** 2, axis=-1, keepdims=True)
                  + jnp.sum((mx - mu) ** 2, axis=-1, keepdims=True))
            rstd = jax.lax.rsqrt(sq / D + 1e-5)
            a_n = (avg - mu) * rstd * g_ref[:, :C] + beta_ref[:, :C]
            m_n = (mx - mu) * rstd * g_ref[:, C:] + beta_ref[:, C:]

            # in_conv Linear(D, D) + GELU, concat folded into a split matmul.
            h = (jnp.dot(a_n, w1_ref[:C, :], preferred_element_type=jnp.float32)
                 + jnp.dot(m_n, w1_ref[C:, :], preferred_element_type=jnp.float32)
                 + b1_ref[...])
            h = _gelu(h)                           # (Bb*T, D)

            # local / global split (D // 2 == C); global = per-batch mean over T.
            local = h[:, :C]                                    # (Bb*T, C)
            glob = jnp.mean(h[:, C:].reshape(Bb, T, C), axis=1)  # (Bb, C)

            # out_conv: Linear(D, D/2) on [local | bcast(glob)] == split matmul.
            lp = jnp.dot(local, w2_ref[:C, :], preferred_element_type=jnp.float32)
            gp = jnp.dot(glob, w2_ref[C:, :], preferred_element_type=jnp.float32)
            h2 = _gelu(lp.reshape(Bb, T, Dh) + gp[:, None, :] + b2_ref[...])
            h2 = h2.reshape(Bb * T, Dh)

            h3 = _gelu(jnp.dot(h2, w3_ref[...], preferred_element_type=jnp.float32)
                       + b3_ref[...])              # (Bb*T, D/4)

            # Final Linear(D/4, 1) as broadcast-mul + lane reduction so the
            # result lands lane-dense as (Bb, T) (w4 stored transposed (1, D/4)).
            s = jnp.sum(h3.reshape(Bb, T, -1) * w4_ref[...], axis=-1) + b4_ref[...]

            # min_max_norm over the T (score) axis — a cheap lane reduction.
            smin = jnp.min(s, axis=-1, keepdims=True)
            smax = jnp.max(s, axis=-1, keepdims=True)
            out_ref[...] = (s - smin) / (smax - smin + 1e-5)

    return kernel


def _vmem_budget_and_cap():
    """Per-generation input-slab budget and physical VMEM capacity."""
    try:
        cap = int(pltpu.get_tpu_info().vmem_capacity_bytes)
    except Exception:
        cap = 64 << 20          # conservative (v7x-sized) fallback
    # Input slab is double-buffered by the pipeline; leave headroom for
    # params, scratch, output and compiler-internal scratch.
    budget = min(cap // 8, 12 << 20)   # ~12 MiB on v5e/v6e (128 MiB), ~8 MiB on v7x
    return budget, cap


def _pick_batch_block(B, per_batch_bytes, budget_bytes):
    """Largest divisor of B whose input slab fits the VMEM budget (bigger is
    better: amortizes grid-step overhead and fills MXU rows). Prefers
    sublane-friendly multiples of 8."""
    bb = int(max(1, min(B, budget_bytes // max(per_batch_bytes, 1))))
    if bb >= B:
        return B
    for cand in range(bb, 0, -1):          # prefer multiples of 8 (sublane)
        if B % cand == 0 and cand % 8 == 0:
            return cand
    for cand in range(bb, 0, -1):
        if B % cand == 0:
            return cand
    return 1


def compute_scores(x, params):
    B, T, N, C = x.shape
    itemsize = x.dtype.itemsize
    budget, cap = _vmem_budget_and_cap()

    # Target Bb*T >= 256 rows so the matmul M dimension fills the MXU
    # (widths D..D/4 are far below 128/256 lanes, so rows are the only lever).
    row_target = 256
    bb_target = min(B, max(1, -(-row_target // T)))

    # Tile N (reduction axis) only if a full-N slab for the row-target batch
    # block would not fit the per-step input budget and N is sublane-tileable.
    Nb = N
    if bb_target * T * N * C * itemsize > budget and N > 8 and N % 8 == 0:
        nb_cap = max(8, budget // max(bb_target * T * C * itemsize, 1))
        for cand in range(min(int(nb_cap), N), 7, -1):
            if N % cand == 0 and cand % 8 == 0:
                Nb = cand
                break

    per_batch = T * Nb * C * itemsize
    Bb = _pick_batch_block(B, per_batch, budget)

    # Explicit scoped-VMEM limit: double-buffered x slab + params + output +
    # sum/max scratch + headroom, clamped below physical capacity.
    param_bytes = sum(int(p.size) * p.dtype.itemsize for p in params)
    needed = (2 * Bb * per_batch
              + 2 * param_bytes
              + 2 * Bb * T * 4
              + 2 * Bb * T * C * 4
              + (4 << 20))
    vmem_limit = int(min(max(needed, 16 << 20), cap - (4 << 20)))

    return pl.pallas_call(
        _make_score_kernel(N),
        out_shape=jax.ShapeDtypeStruct((B, T), jnp.float32),
        grid_spec=pltpu.PrefetchScalarGridSpec(
            num_scalar_prefetch=0,
            grid=(B // Bb, N // Nb),
            in_specs=[pl.BlockSpec((Bb, T, Nb, C), lambda b, n: (b, 0, n, 0))]
                     + [pl.BlockSpec(p.shape, lambda b, n: (0, 0)) for p in params],
            out_specs=pl.BlockSpec((Bb, T), lambda b, n: (b, 0)),
            scratch_shapes=[pltpu.VMEM((Bb * T, C), jnp.float32),   # running sum
                            pltpu.VMEM((Bb * T, C), jnp.float32)],  # running max
        ),
        compiler_params=pltpu.CompilerParams(
            dimension_semantics=("parallel", "arbitrary"),
            vmem_limit_bytes=vmem_limit,
        ),
    )(x, *params)                                  # (B, T), lane-dense


# ---------------------------------------------------------------------------
# Kernel 2: extract_patches_from_indices — per-batch direct HBM->HBM DMA
# gather, pipelined across batches. indices are scalar-prefetched into SMEM;
# x and the output stay in HBM (memory_space=pl.ANY), so the gather is pure
# DMA. Grid step b issues all k copies for batch b, drains batch b-1's
# copies, and flushes its own only on the last step.
# ---------------------------------------------------------------------------
def _gather_kernel(idx_ref, x_hbm, out_hbm, sem):
    b = pl.program_id(0)
    nb = pl.num_programs(0)
    k = idx_ref.shape[1]
    slot = b & 1

    # Issue all k copies for batch b (all SMEM index reads happen before any
    # .wait(), preserving sst->sld forwarding).  k is small & static.
    for j in range(k):
        pltpu.make_async_copy(x_hbm.at[b, idx_ref[b, j]],
                              out_hbm.at[b, j], sem.at[slot, j]).start()

    # Drain batch b-1's copies (issued on the previous grid step); the DMA
    # engine keeps batch b's copies in flight meanwhile.  Only shapes matter
    # for the wait descriptor, so a static src index is fine.
    @pl.when(b > 0)
    def _():
        for j in range(k):
            pltpu.make_async_copy(x_hbm.at[0, 0],
                                  out_hbm.at[b - 1, j],
                                  sem.at[1 - slot, j]).wait()

    # Flush on the last step: drain batch b's own copies before exit.
    @pl.when(b == nb - 1)
    def _():
        for j in range(k):
            pltpu.make_async_copy(x_hbm.at[0, 0],
                                  out_hbm.at[b, j],
                                  sem.at[slot, j]).wait()


def gather_patches(x, indices):
    B, T, N, C = x.shape
    k = indices.shape[-1]
    return pl.pallas_call(
        _gather_kernel,
        out_shape=jax.ShapeDtypeStruct((B, k, N, C), x.dtype),
        grid_spec=pltpu.PrefetchScalarGridSpec(
            num_scalar_prefetch=1,
            grid=(B,),
            in_specs=[pl.BlockSpec(memory_space=pl.ANY)],
            out_specs=pl.BlockSpec(memory_space=pl.ANY),
            scratch_shapes=[pltpu.SemaphoreType.DMA((2, k))],
        ),
        # Cross-step semaphore carry is core-local, so keep "arbitrary"
        # (kernel is DMA-bound anyway). Output is written by manual DMA only:
        # has_side_effects makes the ordering/DCE guarantee explicit.
        compiler_params=pltpu.CompilerParams(
            dimension_semantics=("arbitrary",),
            has_side_effects=True),
    )(indices, x)


# ---------------------------------------------------------------------------
# Glue
# ---------------------------------------------------------------------------
def hard_topk(scores, k):
    # torch.topk(sorted=False).indices -> sort(indices)  ==  top_k + sort
    # (tie-breaking order may differ from torch.topk for exactly-equal scores)
    _, idx = jax.lax.top_k(scores, k)
    return jnp.sort(idx, axis=-1).astype(jnp.int32)


def patchnet_forward(x, params, k):
    """Eval-mode PatchNet(score='tpool').forward(x, type='time', ...)."""
    scores = compute_scores(x, params)            # (B, T)
    indices = hard_topk(scores, k)                # (B, k)
    patches = gather_patches(x, indices)          # (B, k, N, C)  == 'b k n c'
    return patches, scores, indices


def init_params(key, in_channels):
    """Deterministic PredictorLG(embed_dim=2*in_channels) params, (in, out) layout."""
    D = 2 * in_channels

    def lin(k, fin, fout):
        kw, kb = jax.random.split(k)
        bound = 1.0 / math.sqrt(fin)
        w = jax.random.uniform(kw, (fin, fout), jnp.float32, -bound, bound)
        b = jax.random.uniform(kb, (1, fout), jnp.float32, -bound, bound)
        return w, b

    k1, k2, k3, k4 = jax.random.split(key, 4)
    g = jnp.ones((1, D), jnp.float32)
    beta = jnp.zeros((1, D), jnp.float32)
    w1, b1 = lin(k1, D, D)
    w2, b2 = lin(k2, D, D // 2)
    w3, b3 = lin(k3, D // 2, D // 4)
    w4, b4 = lin(k4, D // 4, 1)
    w4 = w4.T          # stored transposed (1, D//4): lane-dense final layer
    return (g, beta, w1, b1, w2, b2, w3, b3, w4, b4)


def reference_scores(x, params):
    g, beta, w1, b1, w2, b2, w3, b3, w4, b4 = params
    h = jnp.concatenate([jnp.mean(x, axis=2), jnp.max(x, axis=2)], axis=-1)
    mu = jnp.mean(h, -1, keepdims=True)
    var = jnp.mean((h - mu) ** 2, -1, keepdims=True)
    h = (h - mu) / jnp.sqrt(var + 1e-5) * g + beta
    h = _gelu(h @ w1 + b1)
    d = h.shape[-1]
    local = h[..., : d // 2]
    glob = jnp.mean(h[..., d // 2:], axis=1, keepdims=True)
    h = jnp.concatenate([local, jnp.broadcast_to(glob, local.shape)], axis=-1)
    h = _gelu(h @ w2 + b2)
    h = _gelu(h @ w3 + b3)
    s = (h @ w4.T + b4)[..., 0]                    # w4 stored as (1, D//4)
    smin = jnp.min(s, -1, keepdims=True)
    smax = jnp.max(s, -1, keepdims=True)
    return (s - smin) / (smax - smin + 1e-5)


if __name__ == "__main__":
    B, T, N, C, K = 2, 16, 16, 16, 4     # H = W = 4, in_channels = 16, k = 4

    key = jax.random.PRNGKey(0)
    kx, kp = jax.random.split(key)
    x = jax.random.normal(kx, (B, T, N, C), jnp.float32)
    params = init_params(kp, C)

    patches, scores, indices = patchnet_forward(x, params, K)
    jax.block_until_ready(patches)

    # light correctness checks against a pure-JAX reference
    ref_s = reference_scores(x, params)
    assert scores.shape == (B, T) and jnp.allclose(scores, ref_s, atol=1e-2, rtol=1e-2)
    expected = x[jnp.arange(B)[:, None], indices]          # (B, k, N, C)
    assert patches.shape == (B, K, N, C) and bool(jnp.array_equal(patches, expected))

    print("KERNEL_OK")
</pallas_src>

<mosaic_0001>
module attributes {stable_mosaic.version = 11 : i64} {
  func.func @kernel(%arg0: i32, %arg1: i32, %arg2: memref<2x16x16x16xf32, #tpu.memory_space<vmem>>, %arg3: memref<1x32xf32, #tpu.memory_space<vmem>>, %arg4: memref<1x32xf32, #tpu.memory_space<vmem>>, %arg5: memref<32x32xf32, #tpu.memory_space<vmem>>, %arg6: memref<1x32xf32, #tpu.memory_space<vmem>>, %arg7: memref<32x16xf32, #tpu.memory_space<vmem>>, %arg8: memref<1x16xf32, #tpu.memory_space<vmem>>, %arg9: memref<16x8xf32, #tpu.memory_space<vmem>>, %arg10: memref<1x8xf32, #tpu.memory_space<vmem>>, %arg11: memref<1x8xf32, #tpu.memory_space<vmem>>, %arg12: memref<1x1xf32, #tpu.memory_space<vmem>>, %arg13: memref<2x16xf32, #tpu.memory_space<vmem>>, %arg14: memref<32x16xf32, #tpu.memory_space<vmem>>, %arg15: memref<32x16xf32, #tpu.memory_space<vmem>>) attributes {dimension_semantics = [#tpu.dimension_semantics<parallel>, #tpu.dimension_semantics<arbitrary>], iteration_bounds = array<i64: 1, 1>, scalar_prefetch = 0 : i64, scratch_operands = 2 : i64, tpu.core_type = #tpu.core_type<tc>, window_params = [{transform_indices = @transform_0, window_bounds = array<i64: 2, 16, 16, 16>}, {pipeline_mode = #tpu.pipeline_mode<synchronous>, transform_indices = @transform_1, window_bounds = array<i64: 1, 32>}, {pipeline_mode = #tpu.pipeline_mode<synchronous>, transform_indices = @transform_2, window_bounds = array<i64: 1, 32>}, {pipeline_mode = #tpu.pipeline_mode<synchronous>, transform_indices = @transform_3, window_bounds = array<i64: 32, 32>}, {pipeline_mode = #tpu.pipeline_mode<synchronous>, transform_indices = @transform_4, window_bounds = array<i64: 1, 32>}, {pipeline_mode = #tpu.pipeline_mode<synchronous>, transform_indices = @transform_5, window_bounds = array<i64: 32, 16>}, {pipeline_mode = #tpu.pipeline_mode<synchronous>, transform_indices = @transform_6, window_bounds = array<i64: 1, 16>}, {pipeline_mode = #tpu.pipeline_mode<synchronous>, transform_indices = @transform_7, window_bounds = array<i64: 16, 8>}, {pipeline_mode = #tpu.pipeline_mode<synchronous>, transform_indices = @transform_8, window_bounds = array<i64: 1, 8>}, {pipeline_mode = #tpu.pipeline_mode<synchronous>, transform_indices = @transform_9, window_bounds = array<i64: 1, 8>}, {pipeline_mode = #tpu.pipeline_mode<synchronous>, transform_indices = @transform_10, window_bounds = array<i64: 1, 1>}, {transform_indices = @transform_11, window_bounds = array<i64: 2, 16>}]} {
    %c0 = arith.constant 0 : index
    %c0_0 = arith.constant 0 : index
    %c0_1 = arith.constant 0 : index
    %c0_2 = arith.constant 0 : index
    %0 = vector.load %arg2[%c0, %c0_0, %c0_1, %c0_2] : memref<2x16x16x16xf32, #tpu.memory_space<vmem>>, vector<2x16x16x16xf32>
    %1 = vector.shape_cast %0 : vector<2x16x16x16xf32> to vector<32x16x16xf32>
    %cst = arith.constant dense<0.000000e+00> : vector<32x16xf32>
    %2 = vector.multi_reduction <add>, %1, %cst [1] : vector<32x16x16xf32> to vector<32x16xf32>
    %cst_3 = arith.constant dense<0xFF800000> : vector<32x16xf32>
    %3 = vector.multi_reduction <maximumf>, %1, %cst_3 [1] : vector<32x16x16xf32> to vector<32x16xf32>
    %c0_i32 = arith.constant 0 : i32
    %4 = arith.cmpi eq, %arg1, %c0_i32 : i32
    %5 = arith.extui %4 : i1 to i32
    %c0_i32_4 = arith.constant 0 : i32
    %6 = arith.cmpi ne, %5, %c0_i32_4 : i32
    scf.if %6 {
      %c0_9 = arith.constant 0 : index
      %c0_10 = arith.constant 0 : index
      %13 = vector.load %arg14[%c0_9, %c0_10] : memref<32x16xf32, #tpu.memory_space<vmem>>, vector<32x16xf32>
      tpu.vector_store %arg14[%c0_9, %c0_10], %2 {strides = array<i32>} : memref<32x16xf32, #tpu.memory_space<vmem>>, vector<32x16xf32>,
      %c0_11 = arith.constant 0 : index
      %c0_12 = arith.constant 0 : index
      %14 = vector.load %arg15[%c0_11, %c0_12] : memref<32x16xf32, #tpu.memory_space<vmem>>, vector<32x16xf32>
      tpu.vector_store %arg15[%c0_11, %c0_12], %3 {strides = array<i32>} : memref<32x16xf32, #tpu.memory_space<vmem>>, vector<32x16xf32>,
    } else {
    }
    %c0_i32_5 = arith.constant 0 : i32
    %7 = arith.cmpi ne, %arg1, %c0_i32_5 : i32
    %8 = arith.extui %7 : i1 to i32
    %c0_i32_6 = arith.constant 0 : i32
    %9 = arith.cmpi ne, %8, %c0_i32_6 : i32
    scf.if %9 {
      %c0_9 = arith.constant 0 : index
      %c0_10 = arith.constant 0 : index
      %13 = vector.load %arg14[%c0_9, %c0_10] : memref<32x16xf32, #tpu.memory_space<vmem>>, vector<32x16xf32>
      %14 = arith.addf %13, %2 : vector<32x16xf32>
      %c0_11 = arith.constant 0 : index
      %c0_12 = arith.constant 0 : index
      %15 = vector.load %arg14[%c0_11, %c0_12] : memref<32x16xf32, #tpu.memory_space<vmem>>, vector<32x16xf32>
      tpu.vector_store %arg14[%c0_11, %c0_12], %14 {strides = array<i32>} : memref<32x16xf32, #tpu.memory_space<vmem>>, vector<32x16xf32>,
      %c0_13 = arith.constant 0 : index
      %c0_14 = arith.constant 0 : index
      %16 = vector.load %arg15[%c0_13, %c0_14] : memref<32x16xf32, #tpu.memory_space<vmem>>, vector<32x16xf32>
      %17 = arith.maximumf %16, %3 : vector<32x16xf32>
      %c0_15 = arith.constant 0 : index
      %c0_16 = arith.constant 0 : index
      %18 = vector.load %arg15[%c0_15, %c0_16] : memref<32x16xf32, #tpu.memory_space<vmem>>, vector<32x16xf32>
      tpu.vector_store %arg15[%c0_15, %c0_16], %17 {strides = array<i32>} : memref<32x16xf32, #tpu.memory_space<vmem>>, vector<32x16xf32>,
    } else {
    }
    %c0_i32_7 = arith.constant 0 : i32
    %10 = arith.cmpi eq, %arg1, %c0_i32_7 : i32
    %11 = arith.extui %10 : i1 to i32
    %c0_i32_8 = arith.constant 0 : i32
    %12 = arith.cmpi ne, %11, %c0_i32_8 : i32
    scf.if %12 {
      %c0_9 = arith.constant 0 : index
      %c0_10 = arith.constant 0 : index
      %13 = vector.load %arg14[%c0_9, %c0_10] : memref<32x16xf32, #tpu.memory_space<vmem>>, vector<32x16xf32>
      %cst_11 = arith.constant 6.250000e-02 : f32
      %14 = vector.broadcast %cst_11 : f32 to vector<32x16xf32>
      %15 = arith.mulf %13, %14 : vector<32x16xf32>
      %c0_12 = arith.constant 0 : index
      %c0_13 = arith.constant 0 : index
      %16 = vector.load %arg15[%c0_12, %c0_13] : memref<32x16xf32, #tpu.memory_space<vmem>>, vector<32x16xf32>
      %cst_14 = arith.constant dense<0.000000e+00> : vector<32xf32>
      %17 = vector.multi_reduction <add>, %15, %cst_14 [1] : vector<32x16xf32> to vector<32xf32>
      %18 = vector.shape_cast %17 : vector<32xf32> to vector<32x1xf32>
      %cst_15 = arith.constant dense<0.000000e+00> : vector<32xf32>
      %19 = vector.multi_reduction <add>, %16, %cst_15 [1] : vector<32x16xf32> to vector<32xf32>
      %20 = vector.shape_cast %19 : vector<32xf32> to vector<32x1xf32>
      %21 = arith.addf %18, %20 : vector<32x1xf32>
      %cst_16 = arith.constant 3.200000e+01 : f32
      %22 = vector.broadcast %cst_16 : f32 to vector<32x1xf32>
      %23 = arith.divf %21, %22 : vector<32x1xf32>
      %24 = vector.broadcast %23 : vector<32x1xf32> to vector<32x16xf32>
      %25 = arith.subf %15, %24 : vector<32x16xf32>
      %26 = arith.mulf %25, %25 : vector<32x16xf32>
      %cst_17 = arith.constant dense<0.000000e+00> : vector<32xf32>
      %27 = vector.multi_reduction <add>, %26, %cst_17 [1] : vector<32x16xf32> to vector<32xf32>
      %28 = vector.shape_cast %27 : vector<32xf32> to vector<32x1xf32>
      %29 = vector.broadcast %23 : vector<32x1xf32> to vector<32x16xf32>
      %30 = arith.subf %16, %29 : vector<32x16xf32>
      %31 = arith.mulf %30, %30 : vector<32x16xf32>
      %cst_18 = arith.constant dense<0.000000e+00> : vector<32xf32>
      %32 = vector.multi_reduction <add>, %31, %cst_18 [1] : vector<32x16xf32> to vector<32xf32>
      %33 = vector.shape_cast %32 : vector<32xf32> to vector<32x1xf32>
      %34 = arith.addf %28, %33 : vector<32x1xf32>
      %cst_19 = arith.constant 3.200000e+01 : f32
      %35 = vector.broadcast %cst_19 : f32 to vector<32x1xf32>
      %36 = arith.divf %34, %35 : vector<32x1xf32>
      %cst_20 = arith.constant 9.99999974E-6 : f32
      %37 = vector.broadcast %cst_20 : f32 to vector<32x1xf32>
      %38 = arith.addf %36, %37 : vector<32x1xf32>
      %39 = math.rsqrt %38 : vector<32x1xf32>
      %40 = vector.broadcast %23 : vector<32x1xf32> to vector<32x16xf32>
      %41 = arith.subf %15, %40 : vector<32x16xf32>
      %42 = vector.broadcast %39 : vector<32x1xf32> to vector<32x16xf32>
      %43 = arith.mulf %41, %42 : vector<32x16xf32>
      %c0_21 = arith.constant 0 : index
      %c0_22 = arith.constant 0 : index
      %44 = vector.load %arg3[%c0_21, %c0_22] : memref<1x32xf32, #tpu.memory_space<vmem>>, vector<1x16xf32>
      %45 = vector.broadcast %44 : vector<1x16xf32> to vector<32x16xf32>
      %46 = arith.mulf %43, %45 : vector<32x16xf32>
      %c0_23 = arith.constant 0 : index
      %c0_24 = arith.constant 0 : index
      %47 = vector.load %arg4[%c0_23, %c0_24] : memref<1x32xf32, #tpu.memory_space<vmem>>, vector<1x16xf32>
      %48 = vector.broadcast %47 : vector<1x16xf32> to vector<32x16xf32>
      %49 = arith.addf %46, %48 : vector<32x16xf32>
      %50 = vector.broadcast %23 : vector<32x1xf32> to vector<32x16xf32>
      %51 = arith.subf %16, %50 : vector<32x16xf32>
      %52 = vector.broadcast %39 : vector<32x1xf32> to vector<32x16xf32>
      %53 = arith.mulf %51, %52 : vector<32x16xf32>
      %c0_25 = arith.constant 0 : index
      %c16 = arith.constant 16 : index
      %54 = vector.load %arg3[%c0_25, %c16] : memref<1x32xf32, #tpu.memory_space<vmem>>, vector<1x16xf32>
      %55 = vector.broadcast %54 : vector<1x16xf32> to vector<32x16xf32>
      %56 = arith.mulf %53, %55 : vector<32x16xf32>
      %c0_26 = arith.constant 0 : index
      %c16_27 = arith.constant 16 : index
      %57 = vector.load %arg4[%c0_26, %c16_27] : memref<1x32xf32, #tpu.memory_space<vmem>>, vector<1x16xf32>
      %58 = vector.broadcast %57 : vector<1x16xf32> to vector<32x16xf32>
      %59 = arith.addf %56, %58 : vector<32x16xf32>
      %c0_28 = arith.constant 0 : index
      %c0_29 = arith.constant 0 : index
      %60 = vector.load %arg5[%c0_28, %c0_29] : memref<32x32xf32, #tpu.memory_space<vmem>>, vector<16x32xf32>
      %cst_30 = arith.constant dense<0.000000e+00> : vector<32x32xf32>
      %61 = tpu.matmul %49, %60, %cst_30 {dimension_numbers = #tpu.dot_dimension_numbers<[1], [0], [0], [1], [0, 0, 1, 1], [], []>} : vector<32x16xf32>, vector<16x32xf32>, vector<32x32xf32> -> vector<32x32xf32>
      %c16_31 = arith.constant 16 : index
      %c0_32 = arith.constant 0 : index
      %62 = vector.load %arg5[%c16_31, %c0_32] : memref<32x32xf32, #tpu.memory_space<vmem>>, vector<16x32xf32>
      %cst_33 = arith.constant dense<0.000000e+00> : vector<32x32xf32>
      %63 = tpu.matmul %59, %62, %cst_33 {dimension_numbers = #tpu.dot_dimension_numbers<[1], [0], [0], [1], [0, 0, 1, 1], [], []>} : vector<32x16xf32>, vector<16x32xf32>, vector<32x32xf32> -> vector<32x32xf32>
      %64 = arith.addf %61, %63 : vector<32x32xf32>
      %c0_34 = arith.constant 0 : index
      %c0_35 = arith.constant 0 : index
      %65 = vector.load %arg6[%c0_34, %c0_35] : memref<1x32xf32, #tpu.memory_space<vmem>>, vector<1x32xf32>
      %66 = vector.broadcast %65 : vector<1x32xf32> to vector<32x32xf32>
      %67 = arith.addf %64, %66 : vector<32x32xf32>
      %cst_36 = arith.constant 5.000000e-01 : f32
      %68 = vector.broadcast %cst_36 : f32 to vector<32x32xf32>
      %69 = arith.mulf %68, %67 : vector<32x32xf32>
      %cst_37 = arith.constant 0.707106769 : f32
      %70 = vector.broadcast %cst_37 : f32 to vector<32x32xf32>
      %71 = arith.mulf %67, %70 : vector<32x32xf32>
      %72 = math.erf %71 : vector<32x32xf32>
      %cst_38 = arith.constant 1.000000e+00 : f32
      %73 = vector.broadcast %cst_38 : f32 to vector<32x32xf32>
      %74 = arith.addf %73, %72 : vector<32x32xf32>
      %75 = arith.mulf %69, %74 : vector<32x32xf32>
      %76 = vector.extract_strided_slice %75 {offsets = [0, 0], sizes = [32, 16], strides = [1, 1]} : vector<32x32xf32> to vector<32x16xf32>
      %77 = vector.extract_strided_slice %75 {offsets = [0, 16], sizes = [32, 16], strides = [1, 1]} : vector<32x32xf32> to vector<32x16xf32>
      %78 = vector.shape_cast %77 : vector<32x16xf32> to vector<2x16x16xf32>
      %cst_39 = arith.constant dense<0.000000e+00> : vector<2x16xf32>
      %79 = vector.multi_reduction <add>, %78, %cst_39 [1] : vector<2x16x16xf32> to vector<2x16xf32>
      %cst_40 = arith.constant 1.600000e+01 : f32
      %80 = vector.broadcast %cst_40 : f32 to vector<2x16xf32>
      %81 = arith.divf %79, %80 : vector<2x16xf32>
      %c0_41 = arith.constant 0 : index
      %c0_42 = arith.constant 0 : index
      %82 = vector.load %arg7[%c0_41, %c0_42] : memref<32x16xf32, #tpu.memory_space<vmem>>, vector<16x16xf32>
      %cst_43 = arith.constant dense<0.000000e+00> : vector<32x16xf32>
      %83 = tpu.matmul %76, %82, %cst_43 {dimension_numbers = #tpu.dot_dimension_numbers<[1], [0], [0], [1], [0, 0, 1, 1], [], []>} : vector<32x16xf32>, vector<16x16xf32>, vector<32x16xf32> -> vector<32x16xf32>
      %c16_44 = arith.constant 16 : index
      %c0_45 = arith.constant 0 : index
      %84 = vector.load %arg7[%c16_44, %c0_45] : memref<32x16xf32, #tpu.memory_space<vmem>>, vector<16x16xf32>
      %cst_46 = arith.constant dense<0.000000e+00> : vector<2x16xf32>
      %85 = tpu.matmul %81, %84, %cst_46 {dimension_numbers = #tpu.dot_dimension_numbers<[1], [0], [0], [1], [0, 0, 1, 1], [], []>} : vector<2x16xf32>, vector<16x16xf32>, vector<2x16xf32> -> vector<2x16xf32>
      %86 = vector.shape_cast %83 : vector<32x16xf32> to vector<2x16x16xf32>
      %87 = vector.shape_cast %85 : vector<2x16xf32> to vector<2x1x16xf32>
      %88 = vector.broadcast %87 : vector<2x1x16xf32> to vector<2x16x16xf32>
      %89 = arith.addf %86, %88 : vector<2x16x16xf32>
      %c0_47 = arith.constant 0 : index
      %c0_48 = arith.constant 0 : index
      %90 = vector.load %arg8[%c0_47, %c0_48] : memref<1x16xf32, #tpu.memory_space<vmem>>, vector<1x16xf32>
      %91 = vector.shape_cast %90 : vector<1x16xf32> to vector<1x1x16xf32>
      %92 = vector.broadcast %91 : vector<1x1x16xf32> to vector<2x16x16xf32>
      %93 = arith.addf %89, %92 : vector<2x16x16xf32>
      %cst_49 = arith.constant 5.000000e-01 : f32
      %94 = vector.broadcast %cst_49 : f32 to vector<2x16x16xf32>
      %95 = arith.mulf %94, %93 : vector<2x16x16xf32>
      %cst_50 = arith.constant 0.707106769 : f32
      %96 = vector.broadcast %cst_50 : f32 to vector<2x16x16xf32>
      %97 = arith.mulf %93, %96 : vector<2x16x16xf32>
      %98 = math.erf %97 : vector<2x16x16xf32>
      %cst_51 = arith.constant 1.000000e+00 : f32
      %99 = vector.broadcast %cst_51 : f32 to vector<2x16x16xf32>
      %100 = arith.addf %99, %98 : vector<2x16x16xf32>
      %101 = arith.mulf %95, %100 : vector<2x16x16xf32>
      %102 = vector.shape_cast %101 : vector<2x16x16xf32> to vector<32x16xf32>
      %c0_52 = arith.constant 0 : index
      %c0_53 = arith.constant 0 : index
      %103 = vector.load %arg9[%c0_52, %c0_53] : memref<16x8xf32, #tpu.memory_space<vmem>>, vector<16x8xf32>
      %cst_54 = arith.constant dense<0.000000e+00> : vector<32x8xf32>
      %104 = tpu.matmul %102, %103, %cst_54 {dimension_numbers = #tpu.dot_dimension_numbers<[1], [0], [0], [1], [0, 0, 1, 1], [], []>} : vector<32x16xf32>, vector<16x8xf32>, vector<32x8xf32> -> vector<32x8xf32>
      %c0_55 = arith.constant 0 : index
      %c0_56 = arith.constant 0 : index
      %105 = vector.load %arg10[%c0_55, %c0_56] : memref<1x8xf32, #tpu.memory_space<vmem>>, vector<1x8xf32>
      %106 = vector.broadcast %105 : vector<1x8xf32> to vector<32x8xf32>
      %107 = arith.addf %104, %106 : vector<32x8xf32>
      %cst_57 = arith.constant 5.000000e-01 : f32
      %108 = vector.broadcast %cst_57 : f32 to vector<32x8xf32>
      %109 = arith.mulf %108, %107 : vector<32x8xf32>
      %cst_58 = arith.constant 0.707106769 : f32
      %110 = vector.broadcast %cst_58 : f32 to vector<32x8xf32>
      %111 = arith.mulf %107, %110 : vector<32x8xf32>
      %112 = math.erf %111 : vector<32x8xf32>
      %cst_59 = arith.constant 1.000000e+00 : f32
      %113 = vector.broadcast %cst_59 : f32 to vector<32x8xf32>
      %114 = arith.addf %113, %112 : vector<32x8xf32>
      %115 = arith.mulf %109, %114 : vector<32x8xf32>
      %116 = vector.shape_cast %115 : vector<32x8xf32> to vector<2x16x8xf32>
      %c0_60 = arith.constant 0 : index
      %c0_61 = arith.constant 0 : index
      %117 = vector.load %arg11[%c0_60, %c0_61] : memref<1x8xf32, #tpu.memory_space<vmem>>, vector<1x8xf32>
      %118 = vector.shape_cast %117 : vector<1x8xf32> to vector<1x1x8xf32>
      %119 = vector.broadcast %118 : vector<1x1x8xf32> to vector<2x16x8xf32>
      %120 = arith.mulf %116, %119 : vector<2x16x8xf32>
      %cst_62 = arith.constant dense<0.000000e+00> : vector<2x16xf32>
      %121 = vector.multi_reduction <add>, %120, %cst_62 [2] : vector<2x16x8xf32> to vector<2x16xf32>
      %c0_63 = arith.constant 0 : index
      %c0_64 = arith.constant 0 : index
      %122 = vector.load %arg12[%c0_63, %c0_64] : memref<1x1xf32, #tpu.memory_space<vmem>>, vector<1x1xf32>
      %123 = vector.broadcast %122 : vector<1x1xf32> to vector<2x16xf32>
      %124 = arith.addf %121, %123 : vector<2x16xf32>
      %cst_65 = arith.constant dense<0x7F800000> : vector<2xf32>
      %125 = vector.multi_reduction <minimumf>, %124, %cst_65 [1] : vector<2x16xf32> to vector<2xf32>
      %126 = vector.shape_cast %125 : vector<2xf32> to vector<2x1xf32>
      %cst_66 = arith.constant dense<0xFF800000> : vector<2xf32>
      %127 = vector.multi_reduction <maximumf>, %124, %cst_66 [1] : vector<2x16xf32> to vector<2xf32>
      %128 = vector.shape_cast %127 : vector<2xf32> to vector<2x1xf32>
      %129 = vector.broadcast %126 : vector<2x1xf32> to vector<2x16xf32>
      %130 = arith.subf %124, %129 : vector<2x16xf32>
      %131 = arith.subf %128, %126 : vector<2x1xf32>
      %cst_67 = arith.constant 9.99999974E-6 : f32
      %132 = vector.broadcast %cst_67 : f32 to vector<2x1xf32>
      %133 = arith.addf %131, %132 : vector<2x1xf32>
      %134 = vector.broadcast %133 : vector<2x1xf32> to vector<2x16xf32>
      %135 = arith.divf %130, %134 : vector<2x16xf32>
      %c0_68 = arith.constant 0 : index
      %c0_69 = arith.constant 0 : index
      %136 = vector.load %arg13[%c0_68, %c0_69] : memref<2x16xf32, #tpu.memory_space<vmem>>, vector<2x16xf32>
      tpu.vector_store %arg13[%c0_68, %c0_69], %135 {strides = array<i32>} : memref<2x16xf32, #tpu.memory_space<vmem>>, vector<2x16xf32>,
    } else {
    }
    return
  }
  func.func @transform_0(%arg0: i32, %arg1: i32) -> (i32, i32, i32, i32) {
    %c0_i32 = arith.constant 0 : i32
    %c0_i32_0 = arith.constant 0 : i32
    %c0_i32_1 = arith.constant 0 : i32
    return %arg0, %c0_i32, %arg1, %c0_i32_0 : i32, i32, i32, i32
  }
  func.func @transform_1(%arg0: i32, %arg1: i32) -> (i32, i32) {
    %c0_i32 = arith.constant 0 : i32
    %c0_i32_0 = arith.constant 0 : i32
    %c0_i32_1 = arith.constant 0 : i32
    return %c0_i32, %c0_i32_0 : i32, i32
  }
  func.func @transform_2(%arg0: i32, %arg1: i32) -> (i32, i32) {
    %c0_i32 = arith.constant 0 : i32
    %c0_i32_0 = arith.constant 0 : i32
    %c0_i32_1 = arith.constant 0 : i32
    return %c0_i32, %c0_i32_0 : i32, i32
  }
  func.func @transform_3(%arg0: i32, %arg1: i32) -> (i32, i32) {
    %c0_i32 = arith.constant 0 : i32
    %c0_i32_0 = arith.constant 0 : i32
    %c0_i32_1 = arith.constant 0 : i32
    return %c0_i32, %c0_i32_0 : i32, i32
  }
  func.func @transform_4(%arg0: i32, %arg1: i32) -> (i32, i32) {
    %c0_i32 = arith.constant 0 : i32
    %c0_i32_0 = arith.constant 0 : i32
    %c0_i32_1 = arith.constant 0 : i32
    return %c0_i32, %c0_i32_0 : i32, i32
  }
  func.func @transform_5(%arg0: i32, %arg1: i32) -> (i32, i32) {
    %c0_i32 = arith.constant 0 : i32
    %c0_i32_0 = arith.constant 0 : i32
    %c0_i32_1 = arith.constant 0 : i32
    return %c0_i32, %c0_i32_0 : i32, i32
  }
  func.func @transform_6(%arg0: i32, %arg1: i32) -> (i32, i32) {
    %c0_i32 = arith.constant 0 : i32
    %c0_i32_0 = arith.constant 0 : i32
    %c0_i32_1 = arith.constant 0 : i32
    return %c0_i32, %c0_i32_0 : i32, i32
  }
  func.func @transform_7(%arg0: i32, %arg1: i32) -> (i32, i32) {
    %c0_i32 = arith.constant 0 : i32
    %c0_i32_0 = arith.constant 0 : i32
    %c0_i32_1 = arith.constant 0 : i32
    return %c0_i32, %c0_i32_0 : i32, i32
  }
  func.func @transform_8(%arg0: i32, %arg1: i32) -> (i32, i32) {
    %c0_i32 = arith.constant 0 : i32
    %c0_i32_0 = arith.constant 0 : i32
    %c0_i32_1 = arith.constant 0 : i32
    return %c0_i32, %c0_i32_0 : i32, i32
  }
  func.func @transform_9(%arg0: i32, %arg1: i32) -> (i32, i32) {
    %c0_i32 = arith.constant 0 : i32
    %c0_i32_0 = arith.constant 0 : i32
    %c0_i32_1 = arith.constant 0 : i32
    return %c0_i32, %c0_i32_0 : i32, i32
  }
  func.func @transform_10(%arg0: i32, %arg1: i32) -> (i32, i32) {
    %c0_i32 = arith.constant 0 : i32
    %c0_i32_0 = arith.constant 0 : i32
    %c0_i32_1 = arith.constant 0 : i32
    return %c0_i32, %c0_i32_0 : i32, i32
  }
  func.func @transform_11(%arg0: i32, %arg1: i32) -> (i32, i32) {
    %c0_i32 = arith.constant 0 : i32
    %c0_i32_0 = arith.constant 0 : i32
    return %arg0, %c0_i32 : i32, i32
  }
}

</mosaic_0001>

<bundles_post_ra>
// kernel: tpu_custom_call.1
= control target key start
LH: loop header
LB: loop body
LE: loop exit
PB: predicated region body
PF: predicated region fallthrough
CT: control target
= control target key end

     0   :  { %s2890_s0 = inlined_call_operand.hbm [shape: f32[2,16,16,16], index: 0, kind: input, shape index: {}]   ;;  %s2891_s1 = inlined_call_operand.vmem [shape: f32[1,32], index: 1, kind: input, shape index: {}]   ;;  %s2892_s2 = inlined_call_operand.vmem [shape: f32[1,32], index: 2, kind: input, shape index: {}]   ;;  %s2893_s3 = inlined_call_operand.vmem [shape: f32[32,32], index: 3, kind: input, shape index: {}]   ;;  %s2894_s4 = inlined_call_operand.vmem [shape: f32[1,32], index: 4, kind: input, shape index: {}]   ;;  %s2895_s5 = inlined_call_operand.vmem [shape: f32[32,16], index: 5, kind: input, shape index: {}]   ;;  %s2896_s6 = inlined_call_operand.vmem [shape: f32[1,16], index: 6, kind: input, shape index: {}]   ;;  %s2897_s7 = inlined_call_operand.vmem [shape: f32[16,8], index: 7, kind: input, shape index: {}]   ;;  %s2898_s8 = inlined_call_operand.vmem [shape: f32[1,8], index: 8, kind: input, shape index: {}]   ;;  %s2899_s9 = inlined_call_operand.vmem [shape: f32[1,8], index: 9, kind: input, shape index: {}]   ;;  %s2900_s10 = inlined_call_operand.<no memory space> [shape: f32[1,1], index: 10, kind: input, shape index: {}]   ;;  %s2901_s11 = inlined_call_operand.hbm [shape: f32[2,16], index: 11, kind: output, shape index: {}]  }
   0x1   :  { %v16_v0 = vstv %s2900_s10 }
   0x2   :  { %17 = vst [vmem:[#allocation4] sm:$0x1] %v16_v0 }
   0x3   :  { %18 = vsyncpa [#allocation6], 0 }
   0x4   :  { %19 = vsyncpa [#allocation7], 0  ;;  %s2155_s19 = smov [#allocation5]   ;;  %s2107_s23 = scalar_lea.hbm %s2890_s0, 8192 }
   0x5   :  { %s25_s20 = sshll.u32 %s2155_s19, 4  ;;  %p2108_p0 = scmp.ne.s32.totalorder %s2890_s0, %s2107_s23  ;;  %s26_s20 = int_to_ptr.vmem [resolvable:$true] %s25_s20 }
   0x6   :  { %p2111_p1 = scmp.lt.u32.totalorder %s2107_s23, %s2890_s0 }
   0x8   :  { %p2113_p2 = pnand %p2111_p1, %p2108_p0 }
   0xa   :  { %2116 = shalt.err (!%p2113_p2)
}
   0xb   :  { %s2117_s10 = scalar_lea.vmem %s26_s20, 8192  ;;  %p2122_p4 = scmp.lt.s32.totalorder %s26_s20, %s26_s20 }
   0xc   :  { %p2118_p3 = scmp.ne.s32.totalorder %s26_s20, %s2117_s10  ;;  %p2123_p5 = scmp.lt.s32.totalorder %s2117_s10, %s2117_s10 }
   0xe   :  { %p2124_p6 = por %p2123_p5, %p2122_p4 }
  0x10   :  { %p2125_p7 = pnand %p2124_p6, %p2118_p3 }
  0x12   :  { %2128 = shalt.err (!%p2125_p7)
}
  0x13   :  { %s2156_s28 = smov 128   ;;  %s2157_s29 = smov 8  }
  0x14   :  { %31 = dma.hbm_to_vmem [thread:$0]  %s2890_s0, 8192, %s26_s20, [#allocation6], %s2156_s28, %s2156_s28, %s2157_s29  }
  0x15   :  { %2151 = dma.done.wait [#allocation6], 8192  }
  0x16   :  { %2152 = vsyncadd [#allocation6], 4294959104  ;;  %vm119_vm0 = vcmask 130048   ;;  %v2240_v1 = vld [vmem:[#allocation5 + $0x80] sm:$0xff]  ;;  %v2242_v2 = vld [vmem:[#allocation5 + $0x88] sm:$0xff]  ;;  %vm732_vm1 = vcmask 1041409  }
  0x17   :  { %v2244_v3 = vld [vmem:[#allocation5 + $0x90] sm:$0xff]  ;;  %v2246_v4 = vld [vmem:[#allocation5 + $0x98] sm:$0xff]  ;;  %v2248_v5 = vld [vmem:[#allocation5 + $0xa0] sm:$0xff]  ;;  %v480_v7 = vsel %vm119_vm0, %v2240_v1, -inf  ;;  %v481_v8 = vsel %vm119_vm0, %v2242_v2, -inf  ;;  %vm734_vm2 = vcmask 1042434  }
  0x18   :  { %v2250_v6 = vld [vmem:[#allocation5 + $0xa8] sm:$0xff]  ;;  %v489_v9 = vsel %vm119_vm0, %v2244_v3, -inf  ;;  %v2258_v10 = vld [vmem:[#allocation5 + $0xb0] sm:$0xff]  ;;  %v2260_v11 = vld [vmem:[#allocation5 + $0xb8] sm:$0xff]  ;;  %v482_v13 = vmax.f32 %v480_v7, %v481_v8  ;;  %v490_v14 = vsel %vm119_vm0, %v2246_v4, -inf  ;;  %v498_v15 = vsel %vm119_vm0, %v2248_v5, -inf }
  0x19   :  { %v2262_v12 = vld [vmem:[#allocation5 + $0xc0] sm:$0xff]  ;;  %v499_v16 = vsel %vm119_vm0, %v2250_v6, -inf  ;;  %v2270_v17 = vld [vmem:[#allocation5 + $0xc8] sm:$0xff]  ;;  %v2272_v18 = vld [vmem:[#allocation5 + $0xd0] sm:$0xff]  ;;  %v491_v20 = vmax.f32 %v489_v9, %v490_v14  ;;  %v507_v22 = vsel %vm119_vm0, %v2258_v10, -inf  ;;  %v508_v23 = vsel %vm119_vm0, %v2260_v11, -inf }
  0x1a   :  { %v2274_v19 = vld [vmem:[#allocation5 + $0xd8] sm:$0xff]  ;;  %v500_v21 = vmax.f32 %v498_v15, %v499_v16  ;;  %v2280_v24 = vld [vmem:[#allocation5 + $0xe0] sm:$0xff]  ;;  %v483_v25 = vrot.slane %v482_v13, 4  ;;  %v509_v26 = vmax.f32 %v507_v22, %v508_v23  ;;  %v516_v27 = vsel %vm119_vm0, %v2262_v12, -inf  ;;  %v2286_v29 = vld [vmem:[#allocation5 + $0xe8] sm:$0xff]  ;;  %s2158_s14 = smov 112  }
  0x1b   :  { %v517_v28 = vsel %vm119_vm0, %v2270_v17, -inf  ;;  %v2288_v30 = vld [vmem:[#allocation5 + $0xf0] sm:$0xff]  ;;  %v492_v31 = vrot.slane %v491_v20, 4  ;;  %v525_v34 = vsel %vm119_vm0, %v2272_v18, -inf  ;;  %v526_v37 = vsel %vm119_vm0, %v2274_v19, -inf  ;;  %v2296_v39 = vld [vmem:[#allocation5 + $0xf8] sm:$0xff] }
  0x1c   :  { %v501_v32 = vrot.slane %v500_v21, 4  ;;  %v518_v33 = vmax.f32 %v516_v27, %v517_v28  ;;  %v484_v35 = vmax.f32 %v482_v13, %v483_v25  ;;  %v510_v36 = vrot.slane %v509_v26, 4  ;;  %v2304_v13 = vld [vmem:[#allocation5] sm:$0xff] }
  0x1d   :  { %v534_v38 = vsel %vm119_vm0, %v2280_v24, -inf  ;;  %v493_v40 = vmax.f32 %v491_v20, %v492_v31  ;;  %v527_v43 = vmax.f32 %v525_v34, %v526_v37  ;;  %v535_v46 = vsel %vm119_vm0, %v2286_v29, -inf }
  0x1e   :  { %v502_v41 = vmax.f32 %v500_v21, %v501_v32  ;;  %v519_v42 = vrot.slane %v518_v33, 4  ;;  %v485_v44 = vrot.slane %v484_v35, 2  ;;  %v511_v45 = vmax.f32 %v509_v26, %v510_v36  ;;  %v2306_v21 = vld [vmem:[#allocation5 + $0x8] sm:$0xff]  ;;  %v2308_v32 = vld [vmem:[#allocation5 + $0x10] sm:$0xff] }
  0x1f   :  { %v543_v47 = vsel %vm119_vm0, %v2288_v30, -inf  ;;  %vm736_vm3 = vcmask 1043459   ;;  %v494_v48 = vrot.slane %v493_v40, 2  ;;  %v528_v51 = vrot.slane %v527_v43, 4 }
  0x20   :  { %v503_v49 = vrot.slane %v502_v41, 2  ;;  %v520_v50 = vmax.f32 %v518_v33, %v519_v42  ;;  %vm738_vm4 = vcmask 1044484   ;;  %v486_v52 = vmax.f32 %v484_v35, %v485_v44  ;;  %v2310_v33 = vld [vmem:[#allocation5 + $0x18] sm:$0xff]  ;;  %v2320_v44 = vld [vmem:[#allocation5 + $0x28] sm:$0xff] }
  0x21   :  { %v512_v53 = vrot.slane %v511_v45, 2  ;;  %v536_v54 = vmax.f32 %v534_v38, %v535_v46  ;;  %v544_v55 = vsel %vm119_vm0, %v2296_v39, -inf  ;;  %vm740_vm5 = vcmask 1045509  }
  0x22   :  { %v495_v56 = vmax.f32 %v493_v40, %v494_v48  ;;  %v504_v57 = vmax.f32 %v502_v41, %v503_v49  ;;  %v521_v58 = vrot.slane %v520_v50, 2  ;;  %v529_v59 = vmax.f32 %v527_v43, %v528_v51  ;;  %v2318_v43 = vld [vmem:[#allocation5 + $0x20] sm:$0xff] }
  0x23   :  { %v487_v60 = vrot.slane %v486_v52, 1  ;;  %v513_v61 = vmax.f32 %v511_v45, %v512_v53  ;;  %v537_v62 = vrot.slane %v536_v54, 4  ;;  %v545_v63 = vmax.f32 %v543_v47, %v544_v55  ;;  %v2328_v53 = vld [vmem:[#allocation5 + $0x30] sm:$0xff]  ;;  %v2332_v55 = vld [vmem:[#allocation5 + $0x40] sm:$0xff] }
  0x24   :  { %v496_v0 = vrot.slane %v495_v56, 1  ;;  %v505_v7 = vrot.slane %v504_v57, 1  ;;  %v522_v8 = vmax.f32 %v520_v50, %v521_v58  ;;  %v530_v9 = vrot.slane %v529_v59, 2 }
  0x25   :  { %vm742_vm6 = vcmask 1046534   ;;  %v488_v14 = vmax.f32 %v486_v52, %v487_v60  ;;  %v514_v15 = vrot.slane %v513_v61, 1  ;;  %v538_v16 = vmax.f32 %v536_v54, %v537_v62  ;;  %v2330_v54 = vld [vmem:[#allocation5 + $0x38] sm:$0xff] }
  0x26   :  { %v546_v20 = vrot.slane %v545_v63, 4  ;;  %v497_v22 = vmax.f32 %v495_v56, %v496_v0  ;;  %v506_v23 = vmax.f32 %v504_v57, %v505_v7  ;;  %v523_v25 = vrot.slane %v522_v8, 1  ;;  %v2341_v0 = vld [vmem:[#allocation5 + $0x50] sm:$0xff] }
  0x27   :  { %v531_v26 = vmax.f32 %v529_v59, %v530_v9  ;;  %vm744_vm7 = vcmask 1047559   ;;  %v515_v27 = vmax.f32 %v513_v61, %v514_v15  ;;  %v539_v28 = vrot.slane %v538_v16, 2 }
  0x28   :  { %v547_v31 = vmax.f32 %v545_v63, %v546_v20  ;;  %v408_v34 = vsel %vm119_vm0, %v2304_v13, -inf  ;;  %v524_v35 = vmax.f32 %v522_v8, %v523_v25  ;;  %v814_v37 = vsel %vm732_vm1, %v497_v22, %v488_v14  ;;  %v2339_v63 = vld [vmem:[#allocation5 + $0x48] sm:$0xff]  ;;  %v2352_v25 = vld [vmem:[#allocation5 + $0x60] sm:$0xff] }
  0x29   :  { %v532_v36 = vrot.slane %v531_v26, 1  ;;  %v409_v38 = vsel %vm119_vm0, %v2306_v21, -inf  ;;  %v540_v40 = vmax.f32 %v538_v16, %v539_v28  ;;  %v815_v42 = vsel %vm734_vm2, %v506_v23, %v814_v37  ;;  %v2350_v23 = vld [vmem:[#allocation5 + $0x58] sm:$0xff]  ;;  %v2359_v37 = vld [vmem:[#allocation5 + $0x68] sm:$0xff] }
  0x2a   :  { %v548_v41 = vrot.slane %v547_v31, 2  ;;  %v410_v45 = vmax.f32 %v408_v34, %v409_v38  ;;  %v816_v47 = vsel %vm736_vm3, %v515_v27, %v815_v42  ;;  %v417_v48 = vsel %vm119_vm0, %v2308_v32, -inf  ;;  %v2361_v38 = vld [vmem:[#allocation5 + $0x70] sm:$0xff] }
  0x2b   :  { %v533_v46 = vmax.f32 %v531_v26, %v532_v36  ;;  %v418_v49 = vsel %vm119_vm0, %v2310_v33, -inf  ;;  %v541_v50 = vrot.slane %v540_v40, 1  ;;  %v817_v52 = vsel %vm738_vm4, %v524_v35, %v816_v47 }
  0x2c   :  { %v549_v51 = vmax.f32 %v547_v31, %v548_v41  ;;  %v411_v56 = vrot.slane %v410_v45, 4  ;;  %v419_v58 = vmax.f32 %v417_v48, %v418_v49  ;;  %v426_v59 = vsel %vm119_vm0, %v2318_v43, -inf  ;;  %v2368_v49 = vld [vmem:[#allocation5 + $0x78] sm:$0xff] }
  0x2d   :  { %v818_v57 = vsel %vm740_vm5, %v533_v46, %v817_v52  ;;  %v427_v60 = vsel %vm119_vm0, %v2320_v44, -inf  ;;  %v542_v61 = vmax.f32 %v540_v40, %v541_v50  ;;  %v435_v14 = vsel %vm119_vm0, %v2328_v53, -inf }
  0x2e   :  { %v550_v62 = vrot.slane %v549_v51, 1  ;;  %v412_v7 = vmax.f32 %v410_v45, %v411_v56  ;;  %v428_v8 = vmax.f32 %v426_v59, %v427_v60  ;;  %v420_v9 = vrot.slane %v419_v58, 4 }
  0x2f   :  { %v436_v15 = vsel %vm119_vm0, %v2330_v54, -inf  ;;  %v444_v16 = vsel %vm119_vm0, %v2332_v55, -inf  ;;  %v819_v22 = vsel %vm742_vm6, %v542_v61, %v818_v57  ;;  %v445_v34 = vsel %vm119_vm0, %v2339_v63, -inf }
  0x30   :  { %v551_v20 = vmax.f32 %v549_v51, %v550_v62  ;;  %v413_v26 = vrot.slane %v412_v7, 2  ;;  %v429_v27 = vrot.slane %v428_v8, 4  ;;  %v421_v28 = vmax.f32 %v419_v58, %v420_v9  ;;  %v2374_v9 = vld [vmem:[#allocation5 + $0x100] sm:$0xff] }
  0x31   :  { %v437_v31 = vmax.f32 %v435_v14, %v436_v15  ;;  %v453_v35 = vsel %vm119_vm0, %v2341_v0, -inf  ;;  %v446_v42 = vmax.f32 %v444_v16, %v445_v34  ;;  %v454_v47 = vsel %vm119_vm0, %v2350_v23, -inf }
  0x32   :  { %v820_v36 = vsel %vm744_vm7, %v551_v20, %v819_v22  ;;  %v414_v40 = vmax.f32 %v412_v7, %v413_v26  ;;  %v430_v41 = vmax.f32 %v428_v8, %v429_v27  ;;  %v422_v45 = vrot.slane %v421_v28, 2 }
  0x33   :  { %840 = vst.msk [vmem:[#allocation3 + $0x8] sm:$0xff] %vm119_vm0, %v820_v36  ;;  %v438_v46 = vrot.slane %v437_v31, 4  ;;  %v462_v48 = vsel %vm119_vm0, %v2352_v25, -inf  ;;  %v447_v52 = vrot.slane %v446_v42, 4  ;;  %v455_v56 = vmax.f32 %v453_v35, %v454_v47  ;;  %v2380_v47 = vld [vmem:[#allocation5 + $0x108] sm:$0xff] }
  0x34   :  { %v415_v50 = vrot.slane %v414_v40, 1  ;;  %v431_v51 = vrot.slane %v430_v41, 2  ;;  %v423_v57 = vmax.f32 %v421_v28, %v422_v45  ;;  %v463_v59 = vsel %vm119_vm0, %v2359_v37, -inf }
  0x35   :  { %v439_v58 = vmax.f32 %v437_v31, %v438_v46  ;;  %v471_v60 = vsel %vm119_vm0, %v2361_v38, -inf  ;;  %v448_v7 = vmax.f32 %v446_v42, %v447_v52  ;;  %v456_v8 = vrot.slane %v455_v56, 4 }
  0x36   :  { %v416_v61 = vmax.f32 %v414_v40, %v415_v50  ;;  %v432_v62 = vmax.f32 %v430_v41, %v431_v51  ;;  %v424_v14 = vrot.slane %v423_v57, 1  ;;  %v464_v16 = vmax.f32 %v462_v48, %v463_v59  ;;  %v2382_v48 = vld [vmem:[#allocation5 + $0x110] sm:$0xff] }
  0x37   :  { %v440_v15 = vrot.slane %v439_v58, 2  ;;  %v472_v20 = vsel %vm119_vm0, %v2368_v49, -inf  ;;  %v449_v26 = vrot.slane %v448_v7, 2  ;;  %v457_v27 = vmax.f32 %v455_v56, %v456_v8 }
  0x38   :  { %v433_v22 = vrot.slane %v432_v62, 1  ;;  %v473_v28 = vmax.f32 %v471_v60, %v472_v20  ;;  %v425_v31 = vmax.f32 %v423_v57, %v424_v14  ;;  %v465_v35 = vrot.slane %v464_v16, 4 }
  0x39   :  { %v441_v34 = vmax.f32 %v439_v58, %v440_v15  ;;  %v552_v36 = vsel %vm119_vm0, %v2374_v9, -inf  ;;  %v450_v42 = vmax.f32 %v448_v7, %v449_v26  ;;  %v458_v45 = vrot.slane %v457_v27, 2  ;;  %v2389_v7 = vld [vmem:[#allocation5 + $0x120] sm:$0xff]  ;;  %v2395_v26 = vld [vmem:[#allocation5 + $0x128] sm:$0xff] }
  0x3a   :  { %v1018_v40 = vld [vmem:[#allocation3 + $0x8] sm:$0xff]  ;;  %v434_v41 = vmax.f32 %v432_v62, %v433_v22  ;;  %v474_v46 = vrot.slane %v473_v28, 4  ;;  %v466_v52 = vmax.f32 %v464_v16, %v465_v35  ;;  %v807_v56 = vsel %vm732_vm1, %v425_v31, %v416_v61  ;;  %v2387_v62 = vld [vmem:[#allocation5 + $0x118] sm:$0xff]  ;;  %2915 = vst [vmem:[#allocation12_spill] sm:$0xff] %v2389_v7  ;;  %2916 = vst [vmem:[#allocation13_spill] sm:$0xff] %v2395_v26 }
  0x3b   :  { %v1036_v50 = vsel %vm119_vm0, %v1018_v40, 0.0  ;;  %v442_v51 = vrot.slane %v441_v34, 1  ;;  %v451_v57 = vrot.slane %v450_v42, 1  ;;  %v459_v58 = vmax.f32 %v457_v27, %v458_v45  ;;  %2914 = vst [vmem:[#allocation11_spill] sm:$0xff] %v2387_v62  ;;  %v2397_v27 = vld [vmem:[#allocation5 + $0x130] sm:$0xff] }
  0x3c   :  { %1037 = vadd.xlane.f32.xlu1 %v1036_v50  ;;  %v475_v59 = vmax.f32 %v473_v28, %v474_v46  ;;  %v808_v60 = vsel %vm734_vm2, %v434_v41, %v807_v56  ;;  %v467_v14 = vrot.slane %v466_v52, 2  ;;  %v553_v15 = vsel %vm119_vm0, %v2380_v47, -inf  ;;  %2917 = vst [vmem:[#allocation14_spill] sm:$0xff] %v2397_v27  ;;  %v2405_v46 = vld [vmem:[#allocation5 + $0x138] sm:$0xff]  ;;  %v2407_v50 = vld [vmem:[#allocation5 + $0x140] sm:$0xff] }
  0x3d   :  { %v443_v8 = vmax.f32 %v441_v34, %v442_v51  ;;  %v561_v16 = vsel %vm119_vm0, %v2382_v48, -inf  ;;  %v452_v20 = vmax.f32 %v450_v42, %v451_v57  ;;  %v460_v61 = vrot.slane %v459_v58, 1  ;;  %2918 = vst [vmem:[#allocation15_spill] sm:$0xff] %v2405_v46  ;;  %2919 = vst [vmem:[#allocation16_spill] sm:$0xff] %v2407_v50 }
  0x3e   :  { %v476_v22 = vrot.slane %v475_v59, 2  ;;  %v554_v28 = vmax.f32 %v552_v36, %v553_v15  ;;  %v468_v31 = vmax.f32 %v466_v52, %v467_v14  ;;  %v562_v34 = vsel %vm119_vm0, %v2387_v62, -inf }
  0x3f   :  { %v809_v35 = vsel %vm736_vm3, %v443_v8, %v808_v60  ;;  %v570_v40 = vsel %vm119_vm0, %v2389_v7, -inf  ;;  %v461_v41 = vmax.f32 %v459_v58, %v460_v61  ;;  %v563_v36 = vmax.f32 %v561_v16, %v562_v34  ;;  %v2414_v58 = vld [vmem:[#allocation5 + $0x148] sm:$0xff]  ;;  %v2422_v34 = vld [vmem:[#allocation5 + $0x158] sm:$0xff] }
  0x40   :  { %v477_v45 = vmax.f32 %v475_v59, %v476_v22  ;;  %v810_v42 = vsel %vm738_vm4, %v452_v20, %v809_v35  ;;  %v555_v51 = vrot.slane %v554_v28, 4  ;;  %v469_v56 = vrot.slane %v468_v31, 1  ;;  %2920 = vst [vmem:[#allocation17_spill] sm:$0xff] %v2414_v58  ;;  %v2416_v59 = vld [vmem:[#allocation5 + $0x150] sm:$0xff]  ;;  %2922 = vst [vmem:[#allocation19_spill] sm:$0xff] %v2422_v34 }
  0x41   :  { %v571_v52 = vsel %vm119_vm0, %v2395_v26, -inf  ;;  %v579_v57 = vsel %vm119_vm0, %v2397_v27, -inf  ;;  %v811_v8 = vsel %vm740_vm5, %v461_v41, %v810_v42  ;;  %2921 = vst [vmem:[#allocation18_spill] sm:$0xff] %v2416_v59  ;;  %v564_v61 = vrot.slane %v563_v36, 4  ;;  %v2424_v27 = vld [vmem:[#allocation5 + $0x160] sm:$0xff] }
  0x42   :  { %v478_v60 = vrot.slane %v477_v45, 1  ;;  %v556_v14 = vmax.f32 %v554_v28, %v555_v51  ;;  %v572_v15 = vmax.f32 %v570_v40, %v571_v52  ;;  %v470_v20 = vmax.f32 %v468_v31, %v469_v56  ;;  %2923 = vst [vmem:[#allocation20_spill] sm:$0xff] %v2424_v27  ;;  %v2432_v56 = vld [vmem:[#allocation5 + $0x168] sm:$0xff] }
  0x43   :  { %v580_v16 = vsel %vm119_vm0, %v2405_v46, -inf  ;;  %v588_v22 = vsel %vm119_vm0, %v2407_v50, -inf  ;;  %v565_v28 = vmax.f32 %v563_v36, %v564_v61  ;;  %v589_v31 = vsel %vm119_vm0, %v2414_v58, -inf  ;;  %2924 = vst [vmem:[#allocation21_spill] sm:$0xff] %v2432_v56  ;;  %v2441_v61 = vld [vmem:[#allocation5 + $0x178] sm:$0xff] }
  0x44   :  { %v479_v35 = vmax.f32 %v477_v45, %v478_v60  ;;  %v557_v41 = vrot.slane %v556_v14, 2  ;;  %v573_v42 = vrot.slane %v572_v15, 4  ;;  %v581_v26 = vmax.f32 %v579_v57, %v580_v16  ;;  %v2434_v45 = vld [vmem:[#allocation5 + $0x170] sm:$0xff] }
  0x45   :  { %v812_v7 = vsel %vm742_vm6, %v470_v20, %v811_v8  ;;  %v597_v40 = vsel %vm119_vm0, %v2416_v59, -inf  ;;  %2925 = vst [vmem:[#allocation22_spill] sm:$0xff] %v2434_v45  ;;  %v566_v57 = vrot.slane %v565_v28, 2  ;;  %v590_v8 = vmax.f32 %v588_v22, %v589_v31 }
  0x46   :  { %v813_v51 = vsel %vm744_vm7, %v479_v35, %v812_v7  ;;  %v558_v52 = vmax.f32 %v556_v14, %v557_v41  ;;  %v574_v60 = vmax.f32 %v572_v15, %v573_v42  ;;  %v582_v50 = vrot.slane %v581_v26, 4 }
  0x47   :  { %839 = vst.msk [vmem:[#allocation3] sm:$0xff] %vm119_vm0, %v813_v51  ;;  %v598_v36 = vsel %vm119_vm0, %v2422_v34, -inf  ;;  %v606_v20 = vsel %vm119_vm0, %v2424_v27, -inf  ;;  %v567_v58 = vmax.f32 %v565_v28, %v566_v57  ;;  %v591_v14 = vrot.slane %v590_v8, 4 }
  0x48   :  { %v559_v7 = vrot.slane %v558_v52, 1  ;;  %v575_v16 = vrot.slane %v574_v60, 2  ;;  %v583_v35 = vmax.f32 %v581_v26, %v582_v50  ;;  %v599_v59 = vmax.f32 %v597_v40, %v598_v36 }
  0x49   :  { %v607_v15 = vsel %vm119_vm0, %v2432_v56, -inf  ;;  %v615_v22 = vsel %vm119_vm0, %v2434_v45, -inf  ;;  %v568_v34 = vrot.slane %v567_v58, 1  ;;  %v592_v27 = vmax.f32 %v590_v8, %v591_v14 }
  0x4a   :  { %v560_v41 = vmax.f32 %v558_v52, %v559_v7  ;;  %v576_v42 = vmax.f32 %v574_v60, %v575_v16  ;;  %v584_v31 = vrot.slane %v583_v35, 2  ;;  %v600_v51 = vrot.slane %v599_v59, 4 }
  0x4b   :  { %v608_v46 = vmax.f32 %v606_v20, %v607_v15  ;;  %v616_v62 = vsel %vm119_vm0, %v2441_v61, -inf  ;;  %v569_v57 = vmax.f32 %v567_v58, %v568_v34  ;;  %v593_v36 = vrot.slane %v592_v27, 2 }
  0x4c   :  { %v577_v26 = vrot.slane %v576_v42, 1  ;;  %v585_v50 = vmax.f32 %v583_v35, %v584_v31  ;;  %v601_v28 = vmax.f32 %v599_v59, %v600_v51  ;;  %v617_v40 = vmax.f32 %v615_v22, %v616_v62 }
  0x4d   :  { %v609_v56 = vrot.slane %v608_v46, 4  ;;  %v120_v45 = vsel %vm119_vm0, %v2304_v13, 0.0  ;;  %v594_v14 = vmax.f32 %v592_v27, %v593_v36  ;;  %v821_v59 = vsel %vm732_vm1, %v569_v57, %v560_v41 }
  0x4e   :  { %v2451_v52 = vld [vmem:[#allocation3] sm:$0xff]  ;;  %v578_v60 = vmax.f32 %v576_v42, %v577_v26  ;;  %v586_v7 = vrot.slane %v585_v50, 1  ;;  %v602_v16 = vrot.slane %v601_v28, 2  ;;  %v618_v8 = vrot.slane %v617_v40, 4 }
  0x4f   :  { %v1033_v20 = vsel %vm119_vm0, %v2451_v52, 0.0  ;;  %v610_v15 = vmax.f32 %v608_v46, %v609_v56  ;;  %v595_v13 = vrot.slane %v594_v14, 1  ;;  %v121_v42 = vsel %vm119_vm0, %v2306_v21, 0.0 }
  0x50   :  { %1034 = vadd.xlane.f32.xlu0 %v1033_v20  ;;  %v587_v62 = vmax.f32 %v585_v50, %v586_v7  ;;  %v603_v58 = vmax.f32 %v601_v28, %v602_v16  ;;  %v619_v34 = vmax.f32 %v617_v40, %v618_v8  ;;  %v822_v35 = vsel %vm734_vm2, %v578_v60, %v821_v59 }
  0x51   :  { %v611_v22 = vrot.slane %v610_v15, 2  ;;  %v129_v31 = vsel %vm119_vm0, %v2308_v32, 0.0  ;;  %v122_v46 = vadd.f32 %v121_v42, %v120_v45  ;;  %v596_v56 = vmax.f32 %v594_v14, %v595_v13 }
  0x52   :  { %v604_v51 = vrot.slane %v603_v58, 1  ;;  %v620_v26 = vrot.slane %v619_v34, 2  ;;  %v823_v27 = vsel %vm736_vm3, %v587_v62, %v822_v35  ;;  %v130_v50 = vsel %vm119_vm0, %v2310_v33, 0.0 }
  0x53   :  { %v612_v41 = vmax.f32 %v610_v15, %v611_v22  ;;  %v138_v28 = vsel %vm119_vm0, %v2318_v43, 0.0  ;;  %v123_v36 = vrot.slane %v122_v46, 4  ;;  %v131_v21 = vadd.f32 %v130_v50, %v129_v31 }
  0x54   :  { %v605_v40 = vmax.f32 %v603_v58, %v604_v51  ;;  %v621_v57 = vmax.f32 %v619_v34, %v620_v26  ;;  %v824_v32 = vsel %vm738_vm4, %v596_v56, %v823_v27  ;;  %v139_v7 = vsel %vm119_vm0, %v2320_v44, 0.0 }
  0x55   :  { %v613_v60 = vrot.slane %v612_v41, 1  ;;  %v147_v45 = vsel %vm119_vm0, %v2328_v53, 0.0  ;;  %v124_v33 = vadd.f32 %v123_v36, %v122_v46  ;;  %v132_v20 = vrot.slane %v131_v21, 4 }
  0x56   :  { %v622_v16 = vrot.slane %v621_v57, 1  ;;  %v825_v8 = vsel %vm740_vm5, %v605_v40, %v824_v32  ;;  %v140_v43 = vadd.f32 %v139_v7, %v138_v28  ;;  %v148_v15 = vsel %vm119_vm0, %v2330_v54, 0.0 }
  0x57   :  { %v614_v14 = vmax.f32 %v612_v41, %v613_v60  ;;  %v156_v59 = vsel %vm119_vm0, %v2332_v55, 0.0  ;;  %v125_v58 = vrot.slane %v124_v33, 2  ;;  %v133_v34 = vadd.f32 %v132_v20, %v131_v21 }
  0x58   :  { %v623_v62 = vmax.f32 %v621_v57, %v622_v16  ;;  %v149_v44 = vadd.f32 %v148_v15, %v147_v45  ;;  %v141_v53 = vrot.slane %v140_v43, 4  ;;  %v157_v13 = vsel %vm119_vm0, %v2339_v63, 0.0 }
  0x59   :  { %v826_v35 = vsel %vm742_vm6, %v614_v14, %v825_v8  ;;  %v165_v22 = vsel %vm119_vm0, %v2341_v0, 0.0  ;;  %v126_v31 = vadd.f32 %v125_v58, %v124_v33  ;;  %v134_v54 = vrot.slane %v133_v34, 2 }
  0x5a   :  { %v827_v42 = vsel %vm744_vm7, %v623_v62, %v826_v35  ;;  %v150_v51 = vrot.slane %v149_v44, 4  ;;  %v142_v55 = vadd.f32 %v141_v53, %v140_v43  ;;  %v158_v26 = vadd.f32 %v157_v13, %v156_v59 }
  0x5b   :  { %841 = vst.msk [vmem:[#allocation3 + $0x10] sm:$0xff] %vm119_vm0, %v827_v42  ;;  %v166_v27 = vsel %vm119_vm0, %v2350_v23, 0.0  ;;  %v174_v46 = vsel %vm119_vm0, %v2352_v25, 0.0  ;;  %v127_v56 = vrot.slane %v126_v31, 1  ;;  %v135_v63 = vadd.f32 %v134_v54, %v133_v34 }
  0x5c   :  { %v151_v41 = vadd.f32 %v150_v51, %v149_v44  ;;  %v167_v50 = vadd.f32 %v166_v27, %v165_v22  ;;  %v143_v0 = vrot.slane %v142_v55, 2  ;;  %v159_v28 = vrot.slane %v158_v26, 4 }
  0x5d   :  { %v175_v40 = vsel %vm119_vm0, %v2359_v37, 0.0  ;;  %v183_v57 = vsel %vm119_vm0, %v2361_v38, 0.0  ;;  %v128_v36 = vadd.f32 %v127_v56, %v126_v31  ;;  %v136_v21 = vrot.slane %v135_v63, 1 }
  0x5e   :  { %v152_v60 = vrot.slane %v151_v41, 2  ;;  %v168_v32 = vrot.slane %v167_v50, 4  ;;  %v144_v23 = vadd.f32 %v143_v0, %v142_v55  ;;  %v160_v7 = vadd.f32 %v159_v28, %v158_v26 }
  0x5f   :  { %v176_v45 = vadd.f32 %v175_v40, %v174_v46  ;;  %v184_v25 = vsel %vm119_vm0, %v2368_v49, 0.0  ;;  %v137_v16 = vadd.f32 %v136_v21, %v135_v63  ;;  %v192_v38 = vsel %vm119_vm0, %v2240_v1, 0.0 }
  0x60   :  { %v153_v8 = vadd.f32 %v152_v60, %v151_v41  ;;  %v169_v33 = vadd.f32 %v168_v32, %v167_v50  ;;  %v185_v20 = vadd.f32 %v184_v25, %v183_v57  ;;  %v145_v14 = vrot.slane %v144_v23, 1 }
  0x61   :  { %v161_v43 = vrot.slane %v160_v7, 2  ;;  %v177_v37 = vrot.slane %v176_v45, 4  ;;  %v733_v34 = vsel %vm732_vm1, %v137_v16, %v128_v36  ;;  %v193_v1 = vsel %vm119_vm0, %v2242_v2, 0.0 }
  0x62   :  { %v2495_v15 = vld [vmem:[#allocation3 + $0x10] sm:$0xff]  ;;  %v154_v59 = vrot.slane %v153_v8, 1  ;;  %v170_v62 = vrot.slane %v169_v33, 2  ;;  %v186_v58 = vrot.slane %v185_v20, 4  ;;  %v146_v44 = vadd.f32 %v145_v14, %v144_v23 }
  0x63   :  { %v1039_v49 = vsel %vm119_vm0, %v2495_v15, 0.0  ;;  %v162_v35 = vadd.f32 %v161_v43, %v160_v7  ;;  %v178_v53 = vadd.f32 %v177_v37, %v176_v45  ;;  %v194_v55 = vadd.f32 %v193_v1, %v192_v38 }
  0x64   :  { %1040 = vadd.xlane.f32.xlu1 %v1039_v49  ;;  %v155_v13 = vadd.f32 %v154_v59, %v153_v8  ;;  %v171_v22 = vadd.f32 %v170_v62, %v169_v33  ;;  %v187_v42 = vadd.f32 %v186_v58, %v185_v20  ;;  %v735_v51 = vsel %vm734_vm2, %v146_v44, %v733_v34 }
  0x65   :  { %v163_v31 = vrot.slane %v162_v35, 1  ;;  %v179_v54 = vrot.slane %v178_v53, 2  ;;  %v201_v56 = vsel %vm119_vm0, %v2244_v3, 0.0  ;;  %v195_v50 = vrot.slane %v194_v55, 4 }
  0x66   :  { %v172_v26 = vrot.slane %v171_v22, 1  ;;  %v188_v27 = vrot.slane %v187_v42, 2  ;;  %v737_v46 = vsel %vm736_vm3, %v155_v13, %v735_v51  ;;  %v202_v0 = vsel %vm119_vm0, %v2246_v4, 0.0 }
  0x67   :  { %v164_v63 = vadd.f32 %v163_v31, %v162_v35  ;;  %v180_v41 = vadd.f32 %v179_v54, %v178_v53  ;;  %v203_v40 = vadd.f32 %v202_v0, %v201_v56  ;;  %v210_v57 = vsel %vm119_vm0, %v2248_v5, 0.0 }
  0x68   :  { %v173_v28 = vadd.f32 %v172_v26, %v171_v22  ;;  %v189_v2 = vadd.f32 %v188_v27, %v187_v42  ;;  %v196_v60 = vadd.f32 %v195_v50, %v194_v55  ;;  %v211_v32 = vsel %vm119_vm0, %v2250_v6, 0.0 }
  0x69   :  { %v181_v36 = vrot.slane %v180_v41, 1  ;;  %v739_v21 = vsel %vm738_vm4, %v164_v63, %v737_v46  ;;  %v204_v7 = vrot.slane %v203_v40, 4  ;;  %v212_v45 = vadd.f32 %v211_v32, %v210_v57 }
  0x6a   :  { %v190_v3 = vrot.slane %v189_v2, 1  ;;  %v741_v23 = vsel %vm740_vm5, %v173_v28, %v739_v21  ;;  %v197_v4 = vrot.slane %v196_v60, 2  ;;  %v219_v16 = vsel %vm119_vm0, %v2258_v10, 0.0 }
  0x6b   :  { %v182_v25 = vadd.f32 %v181_v36, %v180_v41  ;;  %v220_v5 = vsel %vm119_vm0, %v2260_v11, 0.0  ;;  %v205_v33 = vadd.f32 %v204_v7, %v203_v40  ;;  %v213_v20 = vrot.slane %v212_v45, 4 }
  0x6c   :  { %v191_v8 = vadd.f32 %v190_v3, %v189_v2  ;;  %v221_v14 = vadd.f32 %v220_v5, %v219_v16  ;;  %v198_v6 = vadd.f32 %v197_v4, %v196_v60  ;;  %v228_v37 = vsel %vm119_vm0, %v2262_v12, 0.0 }
  0x6d   :  { %v743_v43 = vsel %vm742_vm6, %v182_v25, %v741_v23  ;;  %v229_v38 = vsel %vm119_vm0, %v2270_v17, 0.0  ;;  %v206_v62 = vrot.slane %v205_v33, 2  ;;  %v214_v10 = vadd.f32 %v213_v20, %v212_v45 }
  0x6e   :  { %v745_v59 = vsel %vm744_vm7, %v191_v8, %v743_v43  ;;  %v222_v58 = vrot.slane %v221_v14, 4  ;;  %v199_v11 = vrot.slane %v198_v6, 1  ;;  %v230_v34 = vadd.f32 %v229_v38, %v228_v37 }
  0x6f   :  { %771 = vst.msk [vmem:[#allocation2] sm:$0xff] %vm119_vm0, %v745_v59  ;;  %v237_v49 = vsel %vm119_vm0, %v2272_v18, 0.0  ;;  %v238_v44 = vsel %vm119_vm0, %v2274_v19, 0.0  ;;  %v207_v35 = vadd.f32 %v206_v62, %v205_v33  ;;  %v215_v12 = vrot.slane %v214_v10, 2  ;;  %v2927_v62 = vld [vmem:[#allocation12_spill] sm:$0xff] }
  0x70   :  { %v223_v53 = vadd.f32 %v222_v58, %v221_v14  ;;  %v239_v13 = vadd.f32 %v238_v44, %v237_v49  ;;  %v200_v17 = vadd.f32 %v199_v11, %v198_v6  ;;  %v231_v22 = vrot.slane %v230_v34, 4  ;;  %v2926_v6 = vld [vmem:[#allocation11_spill] sm:$0xff]  ;;  %v2928_v49 = vld [vmem:[#allocation13_spill] sm:$0xff] }
  0x71   :  { %v246_v42 = vsel %vm119_vm0, %v2280_v24, 0.0  ;;  %v247_v1 = vsel %vm119_vm0, %v2286_v29, 0.0  ;;  %v208_v31 = vrot.slane %v207_v35, 1  ;;  %v216_v54 = vadd.f32 %v215_v12, %v214_v10 }
  0x72   :  { %v224_v51 = vrot.slane %v223_v53, 2  ;;  %v240_v55 = vrot.slane %v239_v13, 4  ;;  %v232_v18 = vadd.f32 %v231_v22, %v230_v34  ;;  %v248_v26 = vadd.f32 %v247_v1, %v246_v42  ;;  %v2929_v22 = vld [vmem:[#allocation14_spill] sm:$0xff]  ;;  %v2930_v1 = vld [vmem:[#allocation15_spill] sm:$0xff] }
  0x73   :  { %v255_v19 = vsel %vm119_vm0, %v2288_v30, 0.0  ;;  %v256_v27 = vsel %vm119_vm0, %v2296_v39, 0.0  ;;  %v209_v46 = vadd.f32 %v208_v31, %v207_v35  ;;  %v217_v56 = vrot.slane %v216_v54, 1 }
  0x74   :  { %v225_v63 = vadd.f32 %v224_v51, %v223_v53  ;;  %v241_v41 = vadd.f32 %v240_v55, %v239_v13  ;;  %v233_v24 = vrot.slane %v232_v18, 2  ;;  %v249_v50 = vrot.slane %v248_v26, 4 }
  0x75   :  { %v257_v0 = vadd.f32 %v256_v27, %v255_v19  ;;  %v264_v29 = vsel %vm119_vm0, %v2374_v9, 0.0  ;;  %v218_v2 = vadd.f32 %v217_v56, %v216_v54  ;;  %v746_v36 = vsel %vm732_vm1, %v209_v46, %v200_v17  ;;  %v2931_v27 = vld [vmem:[#allocation16_spill] sm:$0xff]  ;;  %v2932_v56 = vld [vmem:[#allocation17_spill] sm:$0xff] }
  0x76   :  { %v1009_v28 = vld [vmem:[#allocation2] sm:$0xff]  ;;  %v226_v40 = vrot.slane %v225_v63, 1  ;;  %v242_v57 = vrot.slane %v241_v41, 2  ;;  %v234_v21 = vadd.f32 %v233_v24, %v232_v18  ;;  %v250_v39 = vadd.f32 %v249_v50, %v248_v26 }
  0x77   :  { %v2540_v30 = vmul.f32 0.0625, %v1009_v28  ;;  %v258_v60 = vrot.slane %v257_v0, 4  ;;  %v747_v23 = vsel %vm734_vm2, %v218_v2, %v746_v36  ;;  %v265_v7 = vsel %vm119_vm0, %v2380_v47, 0.0  ;;  %v2933_v2 = vld [vmem:[#allocation18_spill] sm:$0xff] }
  0x78   :  { %v227_v32 = vadd.f32 %v226_v40, %v225_v63  ;;  %v243_v3 = vadd.f32 %v242_v57, %v241_v41  ;;  %v235_v45 = vrot.slane %v234_v21, 1  ;;  %v251_v25 = vrot.slane %v250_v39, 2  ;;  %v2934_v57 = vld [vmem:[#allocation19_spill] sm:$0xff] }
  0x79   :  { %v1021_v9 = vsel %vm119_vm0, %v2540_v30, 0.0  ;;  %v259_v4 = vadd.f32 %v258_v60, %v257_v0  ;;  %v266_v8 = vadd.f32 %v265_v7, %v264_v29  ;;  %v273_v33 = vsel %vm119_vm0, %v2382_v48, 0.0  ;;  %v2935_v7 = vld [vmem:[#allocation20_spill] sm:$0xff] }
  0x7a   :  { %1022 = vadd.xlane.f32.xlu0 %v1021_v9  ;;  %v244_v16 = vrot.slane %v243_v3, 1  ;;  %v748_v5 = vsel %vm736_vm3, %v227_v32, %v747_v23  ;;  %v236_v20 = vadd.f32 %v235_v45, %v234_v21  ;;  %v252_v14 = vadd.f32 %v251_v25, %v250_v39  ;;  %v2936_v45 = vld [vmem:[#allocation21_spill] sm:$0xff] }
  0x7b   :  { %v260_v43 = vrot.slane %v259_v4, 2  ;;  %v274_v47 = vsel %vm119_vm0, %v2926_v6, 0.0  ;;  %v267_v38 = vrot.slane %v266_v8, 4  ;;  %v282_v10 = vsel %vm119_vm0, %v2927_v62, 0.0 }
  0x7c   :  { %v245_v37 = vadd.f32 %v244_v16, %v243_v3  ;;  %v275_v59 = vadd.f32 %v274_v47, %v273_v33  ;;  %v253_v58 = vrot.slane %v252_v14, 1  ;;  %v749_v34 = vsel %vm738_vm4, %v236_v20, %v748_v5 }
  0x7d   :  { %v261_v11 = vadd.f32 %v260_v43, %v259_v4  ;;  %v283_v44 = vsel %vm119_vm0, %v2928_v49, 0.0  ;;  %v268_v35 = vadd.f32 %v267_v38, %v266_v8  ;;  %v291_v42 = vsel %vm119_vm0, %v2929_v22, 0.0  ;;  %v2937_v43 = vld [vmem:[#allocation22_spill] sm:$0xff] }
  0x7e   :  { %v750_v48 = vsel %vm740_vm5, %v245_v37, %v749_v34  ;;  %v276_v12 = vrot.slane %v275_v59, 4  ;;  %v284_v53 = vadd.f32 %v283_v44, %v282_v10  ;;  %v254_v13 = vadd.f32 %v253_v58, %v252_v14  ;;  %v2581_v34 = vld [vmem:[#allocation5 + $0x180] sm:$0xff] }
  0x7f   :  { %v262_v17 = vrot.slane %v261_v11, 1  ;;  %v292_v31 = vsel %vm119_vm0, %v2930_v1, 0.0  ;;  %v269_v54 = vrot.slane %v268_v35, 2  ;;  %v300_v46 = vsel %vm119_vm0, %v2931_v27, 0.0 }
  0x80   :  { %v277_v51 = vadd.f32 %v276_v12, %v275_v59  ;;  %v285_v55 = vrot.slane %v284_v53, 4  ;;  %v293_v18 = vadd.f32 %v292_v31, %v291_v42  ;;  %v751_v19 = vsel %vm742_vm6, %v254_v13, %v750_v48  ;;  %v2586_v42 = vld [vmem:[#allocation5 + $0x188] sm:$0xff] }
  0x81   :  { %v263_v26 = vadd.f32 %v262_v17, %v261_v11  ;;  %v301_v63 = vsel %vm119_vm0, %v2932_v56, 0.0  ;;  %v270_v41 = vadd.f32 %v269_v54, %v268_v35  ;;  %v309_v40 = vsel %vm119_vm0, %v2933_v2, 0.0  ;;  %v2604_v2 = vld [vmem:[#allocation5 + $0x1a8] sm:$0xff] }
  0x82   :  { %v278_v24 = vrot.slane %v277_v51, 2  ;;  %v286_v50 = vadd.f32 %v285_v55, %v284_v53  ;;  %v294_v0 = vrot.slane %v293_v18, 4  ;;  %v302_v28 = vadd.f32 %v301_v63, %v300_v46 }
  0x83   :  { %v752_v29 = vsel %vm744_vm7, %v263_v26, %v751_v19  ;;  %v310_v36 = vsel %vm119_vm0, %v2934_v57, 0.0  ;;  %v271_v21 = vrot.slane %v270_v41, 1  ;;  %v318_v9 = vsel %vm119_vm0, %v2935_v7, 0.0  ;;  %v2593_v19 = vld [vmem:[#allocation5 + $0x190] sm:$0xff]  ;;  %v2615_v7 = vld [vmem:[#allocation5 + $0x1b8] sm:$0xff] }
  0x84   :  { %772 = vst.msk [vmem:[#allocation2 + $0x8] sm:$0xff] %vm119_vm0, %v752_v29  ;;  %v279_v39 = vadd.f32 %v278_v24, %v277_v51  ;;  %v287_v60 = vrot.slane %v286_v50, 2  ;;  %v295_v32 = vadd.f32 %v294_v0, %v293_v18  ;;  %v303_v3 = vrot.slane %v302_v28, 4  ;;  %v2600_v29 = vld [vmem:[#allocation5 + $0x198] sm:$0xff] }
  0x85   :  { %v311_v23 = vadd.f32 %v310_v36, %v309_v40  ;;  %v319_v25 = vsel %vm119_vm0, %v2936_v45, 0.0  ;;  %v272_v4 = vadd.f32 %v271_v21, %v270_v41  ;;  %v327_v6 = vsel %vm119_vm0, %v2937_v43, 0.0 }
  0x86   :  { %v280_v16 = vrot.slane %v279_v39, 1  ;;  %v288_v5 = vadd.f32 %v287_v60, %v286_v50  ;;  %v296_v8 = vrot.slane %v295_v32, 2  ;;  %v304_v33 = vadd.f32 %v303_v3, %v302_v28  ;;  %v2602_v28 = vld [vmem:[#allocation5 + $0x1a0] sm:$0xff] }
  0x87   :  { %v312_v20 = vrot.slane %v311_v23, 4  ;;  %v320_v14 = vadd.f32 %v319_v25, %v318_v9  ;;  %v328_v59 = vsel %vm119_vm0, %v2441_v61, 0.0  ;;  %v624_v35 = vsel %vm119_vm0, %v2581_v34, -inf }
  0x88   :  { %v281_v47 = vadd.f32 %v280_v16, %v279_v39  ;;  %v289_v37 = vrot.slane %v288_v5, 1  ;;  %v297_v38 = vadd.f32 %v296_v8, %v295_v32  ;;  %v305_v62 = vrot.slane %v304_v33, 2 }
  0x89   :  { %v313_v10 = vadd.f32 %v312_v20, %v311_v23  ;;  %v321_v58 = vrot.slane %v320_v14, 4  ;;  %v329_v11 = vadd.f32 %v328_v59, %v327_v6  ;;  %v625_v54 = vsel %vm119_vm0, %v2586_v42, -inf  ;;  %v2613_v23 = vld [vmem:[#allocation5 + $0x1b0] sm:$0xff]  ;;  %v2622_v20 = vld [vmem:[#allocation5 + $0x1c0] sm:$0xff] }
  0x8a   :  { %v290_v49 = vadd.f32 %v289_v37, %v288_v5  ;;  %v298_v44 = vrot.slane %v297_v38, 1  ;;  %v753_v48 = vsel %vm732_vm1, %v281_v47, %v272_v4  ;;  %v306_v53 = vadd.f32 %v305_v62, %v304_v33 }
  0x8b   :  { %v1010_v12 = vld [vmem:[#allocation2 + $0x8] sm:$0xff]  ;;  %v314_v13 = vrot.slane %v313_v10, 2  ;;  %v322_v17 = vadd.f32 %v321_v58, %v320_v14  ;;  %v330_v22 = vrot.slane %v329_v11, 4  ;;  %v626_v56 = vmax.f32 %v624_v35, %v625_v54  ;;  %v2631_v58 = vld [vmem:[#allocation5 + $0x1d0] sm:$0xff] }
  0x8c   :  { %v2588_v61 = vmul.f32 0.0625, %v1010_v12  ;;  %v299_v1 = vadd.f32 %v298_v44, %v297_v38  ;;  %v754_v31 = vsel %vm734_vm2, %v290_v49, %v753_v48  ;;  %v307_v51 = vrot.slane %v306_v53, 1  ;;  %v2624_v14 = vld [vmem:[#allocation5 + $0x1c8] sm:$0xff] }
  0x8d   :  { %v315_v55 = vadd.f32 %v314_v13, %v313_v10  ;;  %v323_v18 = vrot.slane %v322_v17, 2  ;;  %v331_v26 = vadd.f32 %v330_v22, %v329_v11  ;;  %v633_v63 = vsel %vm119_vm0, %v2593_v19, -inf  ;;  %v2633_v11 = vld [vmem:[#allocation5 + $0x1d8] sm:$0xff]  ;;  %v2641_v22 = vld [vmem:[#allocation5 + $0x1e0] sm:$0xff] }
  0x8e   :  { %v1024_v27 = vsel %vm119_vm0, %v2588_v61, 0.0  ;;  %v755_v46 = vsel %vm736_vm3, %v299_v1, %v754_v31  ;;  %v308_v41 = vadd.f32 %v307_v51, %v306_v53  ;;  %v627_v40 = vrot.slane %v626_v56, 4  ;;  %v2643_v1 = vld [vmem:[#allocation5 + $0x1e8] sm:$0xff] }
  0x8f   :  { %1025 = vadd.xlane.f32.xlu1 %v1024_v27  ;;  %v316_v24 = vrot.slane %v315_v55, 1  ;;  %v324_v50 = vadd.f32 %v323_v18, %v322_v17  ;;  %v332_v0 = vrot.slane %v331_v26, 2  ;;  %v634_v57 = vsel %vm119_vm0, %v2600_v29, -inf }
  0x90   :  { %v642_v36 = vsel %vm119_vm0, %v2602_v28, -inf  ;;  %v643_v21 = vsel %vm119_vm0, %v2604_v2, -inf  ;;  %v756_v3 = vsel %vm738_vm4, %v308_v41, %v755_v46  ;;  %v628_v9 = vmax.f32 %v626_v56, %v627_v40  ;;  %v2649_v56 = vld [vmem:[#allocation5 + $0x1f0] sm:$0xff] }
  0x91   :  { %v317_v39 = vadd.f32 %v316_v24, %v315_v55  ;;  %v325_v60 = vrot.slane %v324_v50, 1  ;;  %v333_v32 = vadd.f32 %v332_v0, %v331_v26  ;;  %v635_v45 = vmax.f32 %v633_v63, %v634_v57  ;;  %v2651_v0 = vld [vmem:[#allocation5 + $0x1f8] sm:$0xff] }
  0x92   :  { %v644_v25 = vmax.f32 %v642_v36, %v643_v21  ;;  %v651_v4 = vsel %vm119_vm0, %v2613_v23, -inf  ;;  %v652_v33 = vsel %vm119_vm0, %v2615_v7, -inf  ;;  %v629_v43 = vrot.slane %v628_v9, 2 }
  0x93   :  { %v326_v16 = vadd.f32 %v325_v60, %v324_v50  ;;  %v334_v5 = vrot.slane %v333_v32, 1  ;;  %v757_v8 = vsel %vm740_vm5, %v317_v39, %v756_v3  ;;  %v636_v6 = vrot.slane %v635_v45, 4 }
  0x94   :  { %v645_v47 = vrot.slane %v644_v25, 4  ;;  %v653_v37 = vmax.f32 %v651_v4, %v652_v33  ;;  %v660_v62 = vsel %vm119_vm0, %v2622_v20, -inf  ;;  %v661_v10 = vsel %vm119_vm0, %v2624_v14, -inf }
  0x95   :  { %v335_v38 = vadd.f32 %v334_v5, %v333_v32  ;;  %v758_v59 = vsel %vm742_vm6, %v326_v16, %v757_v8  ;;  %v630_v49 = vmax.f32 %v628_v9, %v629_v43  ;;  %v637_v44 = vmax.f32 %v635_v45, %v636_v6 }
  0x96   :  { %v646_v48 = vmax.f32 %v644_v25, %v645_v47  ;;  %v654_v35 = vrot.slane %v653_v37, 4  ;;  %v662_v53 = vmax.f32 %v660_v62, %v661_v10  ;;  %v669_v13 = vsel %vm119_vm0, %v2631_v58, -inf }
  0x97   :  { %v759_v12 = vsel %vm744_vm7, %v335_v38, %v758_v59  ;;  %v670_v17 = vsel %vm119_vm0, %v2633_v11, -inf  ;;  %v631_v31 = vrot.slane %v630_v49, 1  ;;  %v638_v54 = vrot.slane %v637_v44, 2 }
  0x98   :  { %773 = vst.msk [vmem:[#allocation2 + $0x10] sm:$0xff] %vm119_vm0, %v759_v12  ;;  %v647_v51 = vrot.slane %v646_v48, 2  ;;  %v655_v55 = vmax.f32 %v653_v37, %v654_v35  ;;  %v663_v18 = vrot.slane %v662_v53, 4  ;;  %v671_v26 = vmax.f32 %v669_v13, %v670_v17 }
  0x99   :  { %v678_v27 = vsel %vm119_vm0, %v2641_v22, -inf  ;;  %v679_v46 = vsel %vm119_vm0, %v2643_v1, -inf  ;;  %v632_v63 = vmax.f32 %v630_v49, %v631_v31  ;;  %v639_v41 = vmax.f32 %v637_v44, %v638_v54 }
  0x9a   :  { %v648_v24 = vmax.f32 %v646_v48, %v647_v51  ;;  %v656_v50 = vrot.slane %v655_v55, 2  ;;  %v664_v40 = vmax.f32 %v662_v53, %v663_v18  ;;  %v672_v57 = vrot.slane %v671_v26, 4 }
  0x9b   :  { %v680_v36 = vmax.f32 %v678_v27, %v679_v46  ;;  %v687_v21 = vsel %vm119_vm0, %v2649_v56, -inf  ;;  %v640_v39 = vrot.slane %v639_v41, 1  ;;  %v688_v3 = vsel %vm119_vm0, %v2651_v0, -inf }
  0x9c   :  { %v649_v60 = vrot.slane %v648_v24, 1  ;;  %v657_v32 = vmax.f32 %v655_v55, %v656_v50  ;;  %v665_v9 = vrot.slane %v664_v40, 2  ;;  %v673_v45 = vmax.f32 %v671_v26, %v672_v57 }
  0x9d   :  { %v681_v25 = vrot.slane %v680_v36, 4  ;;  %v689_v4 = vmax.f32 %v687_v21, %v688_v3  ;;  %v641_v16 = vmax.f32 %v639_v41, %v640_v39  ;;  %v336_v33 = vsel %vm119_vm0, %v2581_v34, 0.0 }
  0x9e   :  { %v650_v5 = vmax.f32 %v648_v24, %v649_v60  ;;  %v658_v8 = vrot.slane %v657_v32, 1  ;;  %v666_v6 = vmax.f32 %v664_v40, %v665_v9  ;;  %v674_v47 = vrot.slane %v673_v45, 2 }
  0x9f   :  { %v1011_v43 = vld [vmem:[#allocation2 + $0x10] sm:$0xff]  ;;  %v682_v37 = vmax.f32 %v680_v36, %v681_v25  ;;  %v690_v38 = vrot.slane %v689_v4, 4  ;;  %v828_v10 = vsel %vm732_vm1, %v641_v16, %v632_v63  ;;  %v337_v49 = vsel %vm119_vm0, %v2586_v42, 0.0 }
  0xa0   :  { %v2659_v59 = vmul.f32 0.0625, %v1011_v43  ;;  %v659_v62 = vmax.f32 %v657_v32, %v658_v8  ;;  %v667_v44 = vrot.slane %v666_v6, 1  ;;  %v675_v48 = vmax.f32 %v673_v45, %v674_v47 }
  0xa1   :  { %v683_v35 = vrot.slane %v682_v37, 2  ;;  %v691_v12 = vmax.f32 %v689_v4, %v690_v38  ;;  %v829_v53 = vsel %vm734_vm2, %v650_v5, %v828_v10  ;;  %v338_v13 = vadd.f32 %v337_v49, %v336_v33 }
  0xa2   :  { %v1027_v34 = vsel %vm119_vm0, %v2659_v59, 0.0  ;;  %v345_v17 = vsel %vm119_vm0, %v2593_v19, 0.0  ;;  %v668_v31 = vmax.f32 %v666_v6, %v667_v44  ;;  %v676_v54 = vrot.slane %v675_v48, 1 }
  0xa3   :  { %1028 = vadd.xlane.f32.xlu0 %v1027_v34  ;;  %v684_v51 = vmax.f32 %v682_v37, %v683_v35  ;;  %v692_v55 = vrot.slane %v691_v12, 2  ;;  %v830_v42 = vsel %vm736_vm3, %v659_v62, %v829_v53  ;;  %v339_v18 = vrot.slane %v338_v13, 4 }
  0xa4   :  { %v346_v26 = vsel %vm119_vm0, %v2600_v29, 0.0  ;;  %v354_v27 = vsel %vm119_vm0, %v2602_v28, 0.0  ;;  %v677_v46 = vmax.f32 %v675_v48, %v676_v54  ;;  %v831_v24 = vsel %vm738_vm4, %v668_v31, %v830_v42 }
  0xa5   :  { %v685_v63 = vrot.slane %v684_v51, 1  ;;  %v693_v41 = vmax.f32 %v691_v12, %v692_v55  ;;  %v340_v19 = vadd.f32 %v339_v18, %v338_v13  ;;  %v347_v50 = vadd.f32 %v346_v26, %v345_v17 }
  0xa6   :  { %v355_v40 = vsel %vm119_vm0, %v2604_v2, 0.0  ;;  %v363_v57 = vsel %vm119_vm0, %v2613_v23, 0.0  ;;  %v832_v29 = vsel %vm740_vm5, %v677_v46, %v831_v24  ;;  %v364_v32 = vsel %vm119_vm0, %v2615_v7, 0.0 }
  0xa7   :  { %v686_v36 = vmax.f32 %v684_v51, %v685_v63  ;;  %v694_v21 = vrot.slane %v693_v41, 1  ;;  %v356_v39 = vadd.f32 %v355_v40, %v354_v27  ;;  %v341_v60 = vrot.slane %v340_v19, 2 }
  0xa8   :  { %v348_v28 = vrot.slane %v347_v50, 4  ;;  %v372_v3 = vsel %vm119_vm0, %v2622_v20, 0.0  ;;  %v365_v25 = vadd.f32 %v364_v32, %v363_v57  ;;  %v373_v16 = vsel %vm119_vm0, %v2624_v14, 0.0 }
  0xa9   :  { %v695_v9 = vmax.f32 %v693_v41, %v694_v21  ;;  %v833_v45 = vsel %vm742_vm6, %v686_v36, %v832_v29  ;;  %v357_v2 = vrot.slane %v356_v39, 4  ;;  %v342_v4 = vadd.f32 %v341_v60, %v340_v19 }
  0xaa   :  { %v349_v23 = vadd.f32 %v348_v28, %v347_v50  ;;  %v381_v5 = vsel %vm119_vm0, %v2631_v58, 0.0  ;;  %v366_v7 = vrot.slane %v365_v25, 4  ;;  %v374_v43 = vadd.f32 %v373_v16, %v372_v3 }
  0xab   :  { %v834_v8 = vsel %vm744_vm7, %v695_v9, %v833_v45  ;;  %v358_v33 = vadd.f32 %v357_v2, %v356_v39  ;;  %v343_v20 = vrot.slane %v342_v4, 1  ;;  %v382_v47 = vsel %vm119_vm0, %v2633_v11, 0.0 }
  0xac   :  { %842 = vst.msk [vmem:[#allocation3 + $0x18] sm:$0xff] %vm119_vm0, %v834_v8  ;;  %v350_v6 = vrot.slane %v349_v23, 2  ;;  %v390_v37 = vsel %vm119_vm0, %v2641_v22, 0.0  ;;  %v367_v14 = vadd.f32 %v366_v7, %v365_v25  ;;  %v375_v62 = vrot.slane %v374_v43, 4 }
  0xad   :  { %v359_v38 = vrot.slane %v358_v33, 2  ;;  %v383_v10 = vadd.f32 %v382_v47, %v381_v5  ;;  %v391_v49 = vsel %vm119_vm0, %v2643_v1, 0.0  ;;  %v399_v44 = vsel %vm119_vm0, %v2649_v56, 0.0 }
  0xae   :  { %v351_v58 = vadd.f32 %v350_v6, %v349_v23  ;;  %v368_v35 = vrot.slane %v367_v14, 2  ;;  %v376_v12 = vadd.f32 %v375_v62, %v374_v43  ;;  %v344_v53 = vadd.f32 %v343_v20, %v342_v4 }
  0xaf   :  { %v360_v48 = vadd.f32 %v359_v38, %v358_v33  ;;  %v384_v34 = vrot.slane %v383_v10, 4  ;;  %v392_v13 = vadd.f32 %v391_v49, %v390_v37  ;;  %v400_v22 = vsel %vm119_vm0, %v2651_v0, 0.0 }
  0xb0   :  { %v352_v11 = vrot.slane %v351_v58, 1  ;;  %v369_v31 = vadd.f32 %v368_v35, %v367_v14  ;;  %v377_v54 = vrot.slane %v376_v12, 2  ;;  %v401_v1 = vadd.f32 %v400_v22, %v399_v44 }
  0xb1   :  { %v361_v17 = vrot.slane %v360_v48, 1  ;;  %v385_v51 = vadd.f32 %v384_v34, %v383_v10  ;;  %v393_v42 = vrot.slane %v392_v13, 4  ;;  %v2106_v34 = vld [vmem:[#allocation3 + $0x8] sm:$0xff]  ;;  %vm1383_vm8 = vcmask 261248  }
  0xb2   :  { %v353_v55 = vadd.f32 %v352_v11, %v351_v58  ;;  %v370_v26 = vrot.slane %v369_v31, 1  ;;  %v378_v27 = vadd.f32 %v377_v54, %v376_v12  ;;  %v402_v24 = vrot.slane %v401_v1, 4 }
  0xb3   :  { %v2701_v18 = vld [vmem:[#allocation3 + $0x18] sm:$0xff]  ;;  %v362_v56 = vadd.f32 %v361_v17, %v360_v48  ;;  %v386_v46 = vrot.slane %v385_v51, 2  ;;  %v394_v41 = vadd.f32 %v393_v42, %v392_v13  ;;  %vm2160_vm9 = vmmov 0  }
  0xb4   :  { %v1042_v63 = vsel %vm119_vm0, %v2701_v18, 0.0  ;;  %v760_v0 = vsel %vm732_vm1, %v353_v55, %v344_v53  ;;  %v371_v19 = vadd.f32 %v370_v26, %v369_v31  ;;  %v379_v50 = vrot.slane %v378_v27, 1 }
  0xb5   :  { %1043 = vadd.xlane.f32.xlu1 %v1042_v63  ;;  %v387_v40 = vadd.f32 %v386_v46, %v385_v51  ;;  %v761_v57 = vsel %vm734_vm2, %v362_v56, %v760_v0  ;;  %v395_v36 = vrot.slane %v394_v41, 2  ;;  %v403_v21 = vadd.f32 %v402_v24, %v401_v1 }
  0xb6   :  { %v380_v29 = vadd.f32 %v379_v50, %v378_v27  ;;  %v762_v60 = vsel %vm736_vm3, %v371_v19, %v761_v57  ;;  %v1156_v57 = vld [vmem:[%s2893_s3 + $0x10] sm:$0xff]  ;;  %vm1789_vm10 = vcmask 64512   ;;  %vm1831_vm11 = vcmask 130112  }
  0xb7   :  { %v388_v39 = vrot.slane %v387_v40, 1  ;;  %v396_v28 = vadd.f32 %v395_v36, %v394_v41  ;;  %v404_v32 = vrot.slane %v403_v21, 2  ;;  %v1157_v36 = vld [vmem:[%s2893_s3 + $0x18] sm:$0xff]  ;;  %vm1844_vm12 = vcmask 123904  }
  0xb8   :  { %v763_v9 = vsel %vm738_vm4, %v380_v29, %v762_v60  ;;  %v1154_v29 = vld [vmem:[%s2893_s3] sm:$0xff] }
  0xb9   :  { %v389_v3 = vadd.f32 %v388_v39, %v387_v40  ;;  %v397_v45 = vrot.slane %v396_v28, 1  ;;  %v405_v2 = vadd.f32 %v404_v32, %v403_v21  ;;  %v2759_v40 = vld [vmem:[%s2892_s2] ss:$0 sm:$0xff]  ;;  %v2035_v21 = vpack.c.bf16 %v1157_v36, %v1156_v57  ;;  %v1155_v39 = vld [vmem:[%s2893_s3 + $0x8] sm:$0xff] }
  0xba   :  { %v2039_v60 = vpack.c.bf16 %v1155_v39, %v1154_v29 }
  0xbb   :  { %v764_v25 = vsel %vm740_vm5, %v389_v3, %v763_v9  ;;  %v398_v4 = vadd.f32 %v397_v45, %v396_v28  ;;  %v406_v23 = vrot.slane %v405_v2, 1  ;;  %2036 = vmatprep.subr.bf16.mxu0 %v2035_v21 }
  0xbc   :  { %2038 = vmatpush3.bf16.msra.mxu0 %v2035_v21 }
  0xbd   :  { %v407_v16 = vadd.f32 %v406_v23, %v405_v2  ;;  %v765_v5 = vsel %vm742_vm6, %v398_v4, %v764_v25  ;;  %2040 = vmatprep.subr.bf16.mxu0 %v2039_v60 }
  0xbf   :  { %v766_v8 = vsel %vm744_vm7, %v407_v16, %v765_v5 }
  0xc0   :  { %774 = vst.msk [vmem:[#allocation2 + $0x18] sm:$0xff] %vm119_vm0, %v766_v8 }
  0xc7   :  { %v1012_v33 = vld [vmem:[#allocation2 + $0x18] sm:$0xff] }
  0xc8   :  { %v1016_v7 = vmul.f32 0.0625, %v1012_v33 }
  0xc9   :  { %v1038_v58 = vpop.xlane.xlu1 %1037 }
  0xca   :  { %v1030_v43 = vsel %vm119_vm0, %v1016_v7, 0.0 }
  0xcb   :  { %1031 = vadd.xlane.f32.xlu0 %v1030_v43 }
  0xdd   :  { %v1035_v20 = vpop.xlane.xlu0 %1034 }
  0xf1   :  { %v1041_v48 = vpop.xlane.xlu1 %1040 }
 0x107   :  { %v1023_v6 = vpop.xlane.xlu0 %1022 }
 0x108   :  { %v1045_v47 = vadd.f32 %v1035_v20, %v1023_v6 }
 0x10a   :  { %v1050_v37 = vmul.f32 0.03125, %v1045_v47 }
 0x10c   :  { %v2715_v38 = vsub.f32 %v2540_v30, %v1050_v37  ;;  %v2718_v14 = vsub.f32 %v2451_v52, %v1050_v37 }
 0x10e   :  { %v1078_v62 = vmul.f32 %v2718_v14, %v2718_v14  ;;  %v1058_v10 = vmul.f32 %v2715_v38, %v2715_v38 }
 0x110   :  { %v1082_v49 = vsel %vm119_vm0, %v1078_v62, 0.0  ;;  %v1062_v44 = vsel %vm119_vm0, %v1058_v10, 0.0 }
 0x111   :  { %1083 = vadd.xlane.f32.xlu1 %v1082_v49  ;;  %1063 = vadd.xlane.f32.xlu0 %v1062_v44 }
 0x11c   :  { %v1026_v35 = vpop.xlane.xlu1 %1025 }
 0x11d   :  { %v1046_v30 = vadd.f32 %v1038_v58, %v1026_v35 }
 0x11f   :  { %v1051_v12 = vmul.f32 0.03125, %v1046_v30 }
 0x121   :  { %v2727_v52 = vsub.f32 %v2588_v61, %v1051_v12  ;;  %v2729_v53 = vsub.f32 %v2106_v34, %v1051_v12 }
 0x123   :  { %v1079_v11 = vmul.f32 %v2729_v53, %v2729_v53  ;;  %v1059_v13 = vmul.f32 %v2727_v52, %v2727_v52 }
 0x125   :  { %v1085_v22 = vsel %vm119_vm0, %v1079_v11, 0.0  ;;  %v1065_v17 = vsel %vm119_vm0, %v1059_v13, 0.0 }
 0x126   :  { %1086 = vadd.xlane.f32.xlu1 %v1085_v22  ;;  %1066 = vadd.xlane.f32.xlu0 %v1065_v17 }
 0x130   :  { %v1029_v31 = vpop.xlane.xlu0 %1028 }
 0x131   :  { %v1047_v54 = vadd.f32 %v1041_v48, %v1029_v31 }
 0x133   :  { %v1052_v51 = vmul.f32 0.03125, %v1047_v54 }
 0x135   :  { %v2738_v61 = vsub.f32 %v2659_v59, %v1052_v51  ;;  %v1076_v55 = vsub.f32 %v2495_v15, %v1052_v51 }
 0x137   :  { %v1080_v42 = vmul.f32 %v1076_v55, %v1076_v55  ;;  %v1060_v1 = vmul.f32 %v2738_v61, %v2738_v61 }
 0x139   :  { %v1088_v56 = vsel %vm119_vm0, %v1080_v42, 0.0  ;;  %v1068_v26 = vsel %vm119_vm0, %v1060_v1, 0.0 }
 0x13a   :  { %1089 = vadd.xlane.f32.xlu1 %v1088_v56  ;;  %1069 = vadd.xlane.f32.xlu0 %v1068_v26 }
 0x142   :  { %v1044_v27 = vpop.xlane.xlu1 %1043 }
 0x158   :  { %v1032_v46 = vpop.xlane.xlu0 %1031 }
 0x159   :  { %v1048_v63 = vadd.f32 %v1044_v27, %v1032_v46 }
 0x15b   :  { %v1053_v41 = vmul.f32 0.03125, %v1048_v63 }
 0x15d   :  { %v2745_v24 = vsub.f32 %v1016_v7, %v1053_v41  ;;  %v2748_v59 = vsub.f32 %v2701_v18, %v1053_v41  ;;  %v2766_v18 = vld [vmem:[%s2891_s1] ss:$0 sm:$0xff] }
 0x15f   :  { %v1081_v15 = vmul.f32 %v2748_v59, %v2748_v59  ;;  %v1061_v0 = vmul.f32 %v2745_v24, %v2745_v24 }
 0x161   :  { %v1091_v19 = vsel %vm119_vm0, %v1081_v15, 0.0  ;;  %v1071_v50 = vsel %vm119_vm0, %v1061_v0, 0.0  ;;  %v2159_v0 = vmov 0.0|0.0  }
 0x162   :  { %1092 = vadd.xlane.f32.xlu1 %v1091_v19  ;;  %1072 = vadd.xlane.f32.xlu0 %v1071_v50  ;;  %v1947_v19 = vld [vmem:[%s2894_s4] ss:$0 sm:$0xff] }
 0x173   :  { %1147 = vrot.lane.b32.xlu1 %v2759_v40, %s2158_s14 }
 0x178   :  { %1140 = vrot.lane.b32.xlu0 %v2766_v18, %s2158_s14 }
 0x19e   :  { %v1084_v28 = vpop.xlane.xlu1 %1083  ;;  %v1064_v32 = vpop.xlane.xlu0 %1063 }
 0x19f   :  { %v1094_v25 = vadd.f32 %v1084_v28, %v1064_v32 }
 0x1a1   :  { %v1098_v16 = vmul.f32 0.03125, %v1094_v25 }
 0x1a3   :  { %v1102_v33 = vadd.f32 1e-05, %v1098_v16 }
 0x1a5   :  { %2070 = vrsqrt.f32 %v1102_v33 }
 0x1af   :  { %v2071_v20 = vpop.eup %2070 }
 0x1b0   :  { %v1136_v44 = vmul.f32 %v2071_v20, %v2718_v14  ;;  %v1110_v14 = vmul.f32 %v2071_v20, %v2715_v38 }
 0x1b3   :  { %v1087_v3 = vpop.xlane.xlu1 %1086  ;;  %v1067_v9 = vpop.xlane.xlu0 %1066 }
 0x1b4   :  { %v1095_v4 = vadd.f32 %v1087_v3, %v1067_v9 }
 0x1b6   :  { %v1099_v5 = vmul.f32 0.03125, %v1095_v4  ;;  %v1504_v4 = vld [vmem:[%s2895_s5 + $0x10] sm:$0xff] }
 0x1b8   :  { %v1103_v7 = vadd.f32 1e-05, %v1099_v5 }
 0x1ba   :  { %2072 = vrsqrt.f32 %v1103_v7 }
 0x1c4   :  { %v2073_v6 = vpop.eup %2072 }
 0x1c5   :  { %v1137_v58 = vmul.f32 %v2073_v6, %v2729_v53  ;;  %v1111_v54 = vmul.f32 %v2073_v6, %v2727_v52 }
 0x1c7   :  { %v1090_v45 = vpop.xlane.xlu1 %1089  ;;  %v1070_v2 = vpop.xlane.xlu0 %1069  ;;  %v1122_v56 = vmul.f32 %v2766_v18, %v1111_v54 }
 0x1c8   :  { %v1096_v23 = vadd.f32 %v1090_v45, %v1070_v2 }
 0x1c9   :  { %v1133_v38 = vadd.f32 %v2759_v40, %v1122_v56 }
 0x1ca   :  { %v1100_v8 = vmul.f32 0.03125, %v1096_v23  ;;  %v1505_v23 = vld [vmem:[%s2895_s5 + $0x18] sm:$0xff] }
 0x1cc   :  { %v1104_v43 = vadd.f32 1e-05, %v1100_v8 }
 0x1ce   :  { %2074 = vrsqrt.f32 %v1104_v43  ;;  %v2048_v43 = vpack.c.bf16 %v1505_v23, %v1504_v4 }
 0x1d8   :  { %v2075_v47 = vpop.eup %2074 }
 0x1d9   :  { %v1138_v49 = vmul.f32 %v2075_v47, %v1076_v55  ;;  %v1121_v55 = vmul.f32 %v2766_v18, %v1110_v14  ;;  %v1112_v42 = vmul.f32 %v2075_v47, %v2738_v61 }
 0x1db   :  { %v1132_v46 = vadd.f32 %v2759_v40, %v1121_v55  ;;  %v1123_v63 = vmul.f32 %v2766_v18, %v1112_v42 }
 0x1dd   :  { %v1134_v61 = vadd.f32 %v2759_v40, %v1123_v63 }
 0x1ef   :  { %v1093_v37 = vpop.xlane.xlu1 %1092  ;;  %v1073_v62 = vpop.xlane.xlu0 %1072 }
 0x1f0   :  { %v1097_v10 = vadd.f32 %v1093_v37, %v1073_v62 }
 0x1f2   :  { %v1101_v48 = vmul.f32 0.03125, %v1097_v10 }
 0x1f3   :  { %v1141_v35 = vpop.permute.xlu0 %1140  ;;  %v1148_v30 = vpop.permute.xlu1 %1147 }
 0x1f4   :  { %v1105_v12 = vadd.f32 1e-05, %v1101_v48  ;;  %v1144_v34 = vmul.f32 %v1141_v35, %v1137_v58  ;;  %v1145_v11 = vmul.f32 %v1141_v35, %v1138_v49  ;;  %v1143_v13 = vmul.f32 %v1141_v35, %v1136_v44 }
 0x1f6   :  { %2076 = vrsqrt.f32 %v1105_v12  ;;  %v1151_v22 = vadd.f32 %v1148_v30, %v1144_v34  ;;  %v1152_v17 = vadd.f32 %v1148_v30, %v1145_v11  ;;  %v1150_v31 = vadd.f32 %v1148_v30, %v1143_v13 }
 0x1f7   :  { %v2161_v13 = vmov 0.0  }
 0x1f8   :  { %1992 = vmatprep.mubr.msk.f32.mxu0 %vm119_vm0, %v1150_v31 }
 0x1f9   :  { %1993 = vmatmul.mubr.msk.f32.vlgmr.msra.gmra.mrb[0].mxu0 %vm119_vm0, %v1151_v22 }
 0x1fa   :  { %1995 = vmatprep.mubr.msk.f32.mxu0 %vm119_vm0, %v1152_v17  ;;  %2042 = vmatpush3.bf16.msra.mxu0 %v2039_v60 }
 0x200   :  { %v2077_v53 = vpop.eup %2076 }
 0x201   :  { %v1139_v51 = vmul.f32 %v2077_v53, %v2748_v59  ;;  %v1113_v27 = vmul.f32 %v2077_v53, %v2745_v24  ;;  %v1405_v24 = vld [vmem:[%s2895_s5] sm:$0xff]  ;;  %v1406_v59 = vld [vmem:[%s2895_s5 + $0x8] sm:$0xff] }
 0x202   :  { %v2043_v15 = vpack.c.bf16 %v1406_v59, %v1405_v24  ;;  %v1653_v24 = vld [vmem:[%s2897_s7 + $0x8] sm:$0xff] }
 0x203   :  { %v1146_v1 = vmul.f32 %v1141_v35, %v1139_v51  ;;  %v1124_v52 = vmul.f32 %v2766_v18, %v1113_v27 }
 0x204   :  { %2044 = vmatprep.subr.bf16.mxu1 %v2043_v15 }
 0x205   :  { %v1153_v26 = vadd.f32 %v1148_v30, %v1146_v1  ;;  %v1135_v41 = vadd.f32 %v2759_v40, %v1124_v52  ;;  %2046 = vmatpush3.bf16.msra.mxu1 %v2043_v15  ;;  %v2162_v15 = vmov 1966171168  }
 0x206   :  { %2047 = vmatprep.subr.bf16.mxu1 %v2159_v0  ;;  %v1586_v0 = vunpack.c.l.s4 %v2162_v15  ;;  %v1959_v15 = vld [vmem:[%s2899_s9] ss:$0 sm:$0xff]  ;;  %s2164_s9 = smov [#allocation8]  }
 0x207   :  { %1996 = vmatmul.mubr.msk.f32.gmra.mrb[2].mxu0 %vm119_vm0, %v1153_v26  ;;  %s1928_s16 = sshll.u32 %s2164_s9, 4  ;;  %s1929_s16 = int_to_ptr.vmem [resolvable:$true] %s1928_s16 }
 0x208   :  { %2002 = vmatprep.mubr.msk.f32.mxu0 %vm119_vm0, %v1132_v46  ;;  %s2129_s17 = scalar_lea.vmem %s1929_s16, 32  ;;  %p2134_p9 = scmp.lt.s32.totalorder %s1929_s16, %s1929_s16 }
 0x209   :  { %p2130_p8 = scmp.ne.s32.totalorder %s1929_s16, %s2129_s17  ;;  %p2135_p10 = scmp.lt.s32.totalorder %s2129_s17, %s2129_s17 }
 0x20b   :  { %2003 = vmatmul.mubr.msk.f32.vlgmr.msra.gmra.mrb[0].mxu0 %vm119_vm0, %v1133_v38  ;;  %p2136_p11 = por %p2135_p10, %p2134_p9 }
 0x20c   :  { %2005 = vmatprep.mubr.msk.f32.mxu0 %vm119_vm0, %v1134_v61 }
 0x20d   :  { %p2137_p12 = pnand %p2136_p11, %p2130_p8 }
 0x20f   :  { %2006 = vmatmul.mubr.msk.f32.gmra.mrb[2].mxu0 %vm119_vm0, %v1135_v41  ;;  %v1652_v41 = vld [vmem:[%s2897_s7] sm:$0xff] }
 0x210   :  { %v2050_v59 = vpack.c.bf16 %v1653_v24, %v1652_v41 }
 0x2de   :  { %v2004_v50 = vpop.f32.mrb[0].mxu0 }
 0x2df   :  { %v1360_v40 = vadd.f32 %v2004_v50, %v1947_v19  ;;  %v1333_v18 = vpop.f32.mrb[1].mxu0  ;;  %v1587_v50 = vunpack.c.0.s8 %v1586_v0 }
 0x2e0   :  { %v1359_v57 = vadd.f32 %v1947_v19, %v1333_v18 }
 0x2e1   :  { %v1368_v36 = vmul.f32 0.70710677, %v1360_v40  ;;  %v1364_v2 = vmul.f32 0.5, %v1360_v40 }
 0x2e2   :  { %v1367_v21 = vmul.f32 0.70710677, %v1359_v57  ;;  %v2007_v29 = vpop.f32.mrb[2].mxu0  ;;  %v1363_v16 = vmul.f32 0.5, %v1359_v57 }
 0x2e3   :  { %2078 = verf.f32 %v1368_v36  ;;  %v1362_v39 = vadd.f32 %v2007_v29, %v1947_v19  ;;  %v1343_v60 = vpop.f32.mrb[3].mxu0 }
 0x2e4   :  { %2080 = verf.f32 %v1367_v21  ;;  %v1361_v28 = vadd.f32 %v1947_v19, %v1343_v60  ;;  %v1588_v19 = vlaneseq }
 0x2e5   :  { %v1370_v32 = vmul.f32 0.70710677, %v1362_v39  ;;  %v1366_v6 = vmul.f32 0.5, %v1362_v39 }
 0x2e6   :  { %v1369_v3 = vmul.f32 0.70710677, %v1361_v28  ;;  %v1365_v62 = vmul.f32 0.5, %v1361_v28  ;;  %v2838_v40 = vshrl.u32 %v1588_v19, 7 }
 0x2e7   :  { %2082 = verf.f32 %v1370_v32 }
 0x2e8   :  { %2084 = verf.f32 %v1369_v3  ;;  %v1590_v18 = vsub.s32 %v1587_v50, %v2838_v40  ;;  %v2842_v21 = vsub.s32 0, %v2838_v40  ;;  %v1953_v3 = vld [vmem:[%s2896_s6] ss:$0 sm:$0xff] }
 0x2ed   :  { %v2079_v9 = vpop.eup %2078 }
 0x2ee   :  { %v2081_v45 = vpop.eup %2080  ;;  %v1376_v25 = vadd.f32 1.0, %v2079_v9 }
 0x2ef   :  { %v1375_v5 = vadd.f32 1.0, %v2081_v45 }
 0x2f0   :  { %v1380_v8 = vmul.f32 %v1376_v25, %v1364_v2 }
 0x2f1   :  { %v2083_v33 = vpop.eup %2082  ;;  %v1379_v7 = vmul.f32 %v1375_v5, %v1363_v16 }
 0x2f2   :  { %v2085_v20 = vpop.eup %2084  ;;  %v1378_v47 = vadd.f32 1.0, %v2083_v33  ;;  %v1385_v37 = vsel %vm1383_vm8, %v1380_v8, 0.0 }
 0x2f3   :  { %v1377_v10 = vadd.f32 1.0, %v2085_v20  ;;  %v1384_v58 = vsel %vm1383_vm8, %v1379_v7, 0.0  ;;  %2012 = vmatprep.mubr.msk.f32.mxu1 %vm119_vm0, %v1379_v7 }
 0x2f4   :  { %v1382_v49 = vmul.f32 %v1378_v47, %v1366_v6  ;;  %v1386_v44 = vadd.f32 %v1385_v37, %v1384_v58  ;;  %2013 = vmatmul.mubr.msk.f32.vlgmr.msra.gmra.mrb[0].mxu1 %vm119_vm0, %v1380_v8 }
 0x2f5   :  { %v1381_v48 = vmul.f32 %v1377_v10, %v1365_v62  ;;  %2049 = vmatpush3.bf16.msra.mxu1 %v2048_v43 }
 0x2f6   :  { %v1394_v35 = vsel %vm1383_vm8, %v1382_v49, 0.0  ;;  %v1387_v30 = vrot.slane %v1386_v44, 4  ;;  %2051 = vmatprep.subr.bf16.mxu1 %v2050_v59 }
 0x2f7   :  { %v1393_v12 = vsel %vm1383_vm8, %v1381_v48, 0.0  ;;  %2015 = vmatprep.mubr.msk.f32.mxu1 %vm119_vm0, %v1381_v48 }
 0x2f8   :  { %v1395_v34 = vadd.f32 %v1394_v35, %v1393_v12  ;;  %v1388_v11 = vadd.f32 %v1387_v30, %v1386_v44  ;;  %2016 = vmatmul.mubr.msk.f32.gmra.mrb[2].mxu1 %vm119_vm0, %v1382_v49 }
 0x2f9   :  { %2022 = vmatprep.mubr.msk.f32.mxu1 %vm2160_vm9, %v2161_v13 }
 0x2fa   :  { %v1396_v22 = vrot.slane %v1395_v34, 4  ;;  %v1389_v17 = vrot.slane %v1388_v11, 2 }
 0x2fc   :  { %v1397_v31 = vadd.f32 %v1396_v22, %v1395_v34  ;;  %v1390_v14 = vadd.f32 %v1389_v17, %v1388_v11  ;;  %v2163_v17 = vmov 0  }
 0x2fd   :  { %2068 = vset.pattern.permute.xlu1 %v2163_v17  ;;  %2069 = vset.pattern.permute.xlu0 %v2163_v17 }
 0x2fe   :  { %v1391_v53 = vrot.slane %v1390_v14, 1  ;;  %v1398_v54 = vrot.slane %v1397_v31, 2 }
 0x300   :  { %v1399_v51 = vadd.f32 %v1398_v54, %v1397_v31  ;;  %v1392_v55 = vadd.f32 %v1391_v53, %v1390_v14  ;;  %v1954_v31 = vld [vmem:[%s2898_s8] ss:$0 sm:$0xff] }
 0x302   :  { %v1400_v42 = vrot.slane %v1399_v51, 1  ;;  %v1403_v56 = vmul.f32 0.0625, %v1392_v55 }
 0x304   :  { %v1401_v1 = vadd.f32 %v1400_v42, %v1399_v51 }
 0x306   :  { %v1404_v26 = vmul.f32 0.0625, %v1401_v1 }
 0x308   :  { %v1509_v27 = vsel %vm732_vm1, %v1404_v26, %v1403_v56 }
 0x309   :  { %1510 = vrot.lane.b32.xlu1 %v1509_v27, %s2158_s14 }
 0x37b   :  { %v1511_v46 = vpop.permute.xlu1 %1510 }
 0x37c   :  { %2023 = vmatmul.mubr.msk.f32.vlgmr.msra.gmra.mrb[4].mxu1 %vm119_vm0, %v1511_v46 }
 0x37d   :  { %2053 = vmatpush3.bf16.msra.mxu1 %v2050_v59 }
 0x3c7   :  { %v2014_v63 = vpop.f32.mrb[0].mxu1 }
 0x3c8   :  { %v1485_v38 = vpop.f32.mrb[1].mxu1 }
 0x3cb   :  { %v2017_v52 = vpop.f32.mrb[2].mxu1 }
 0x3cc   :  { %v1495_v61 = vpop.f32.mrb[3].mxu1 }
 0x44f   :  { %v1580_v57 = vpop.f32.mrb[4].mxu1 }
 0x450   :  { %v1591_v36 = vrot.slane %v1580_v57, %v1590_v18  ;;  %v2024_v29 = vpop.f32.mrb[5].mxu1 }
 0x452   :  { %v1592_v39 = vcombine.high %v1591_v36, %v1591_v36  ;;  %v1599_v60 = vrot.slane %v1591_v36, %v1590_v18 }
 0x454   :  { %v1606_v28 = vrot.slane %v1592_v39, %v1590_v18  ;;  %v1610_v32 = vrot.slane %v1599_v60, %v2842_v21 }
 0x456   :  { %v1614_v9 = vrot.slane %v1606_v28, %v2842_v21  ;;  %v1617_v45 = vadd.f32 %v1610_v32, %v1485_v38  ;;  %v1618_v2 = vadd.f32 %v2014_v63, %v1610_v32 }
 0x458   :  { %v1619_v25 = vadd.f32 %v1614_v9, %v1495_v61  ;;  %v1620_v4 = vadd.f32 %v2017_v52, %v1614_v9  ;;  %v1628_v23 = vadd.f32 %v1953_v3, %v1617_v45  ;;  %v1629_v16 = vadd.f32 %v1953_v3, %v1618_v2 }
 0x45a   :  { %v1630_v5 = vadd.f32 %v1953_v3, %v1619_v25  ;;  %v1631_v8 = vadd.f32 %v1953_v3, %v1620_v4  ;;  %v1636_v33 = vmul.f32 0.70710677, %v1628_v23  ;;  %v1637_v7 = vmul.f32 0.70710677, %v1629_v16 }
 0x45b   :  { %v1632_v37 = vmul.f32 0.5, %v1628_v23  ;;  %v1633_v58 = vmul.f32 0.5, %v1629_v16 }
 0x45c   :  { %v1638_v43 = vmul.f32 0.70710677, %v1630_v5  ;;  %v1639_v20 = vmul.f32 0.70710677, %v1631_v8  ;;  %2086 = verf.f32 %v1636_v33  ;;  %v1634_v35 = vmul.f32 0.5, %v1630_v5 }
 0x45d   :  { %2088 = verf.f32 %v1637_v7  ;;  %v1635_v13 = vmul.f32 0.5, %v1631_v8  ;;  %v1960_v5 = vld [vmem:[#allocation4] ss:$0 sm:$0xff]  ;;  %v1821_v8 = vand.u32 127, %v1588_v19 }
 0x45e   :  { %2090 = verf.f32 %v1638_v43 }
 0x45f   :  { %2092 = verf.f32 %v1639_v20  ;;  %v1826_v43 = vadd.s32 4294967288, %v1821_v8 }
 0x466   :  { %v2087_v6 = vpop.eup %2086 }
 0x467   :  { %v2089_v47 = vpop.eup %2088  ;;  %v1644_v62 = vadd.f32 1.0, %v2087_v6 }
 0x468   :  { %v2091_v10 = vpop.eup %2090  ;;  %v1645_v49 = vadd.f32 1.0, %v2089_v47  ;;  %v1824_v47 = vsub.s32 %v1821_v8, %v2838_v40 }
 0x469   :  { %v2093_v44 = vpop.eup %2092  ;;  %v1648_v48 = vmul.f32 %v1644_v62, %v1632_v37  ;;  %v1646_v30 = vadd.f32 1.0, %v2091_v10  ;;  %v1829_v37 = vsub.s32 %v1826_v43, %v2838_v40 }
 0x46a   :  { %v1649_v12 = vmul.f32 %v1645_v49, %v1633_v58  ;;  %v1647_v34 = vadd.f32 1.0, %v2093_v44 }
 0x46b   :  { %2029 = vmatprep.mubr.msk.f32.mxu1 %vm119_vm0, %v1648_v48  ;;  %v1650_v11 = vmul.f32 %v1646_v30, %v1634_v35 }
 0x46c   :  { %2030 = vmatmul.mubr.msk.f32.vlgmr.msra.gmra.mrb[6].mxu1 %vm119_vm0, %v1649_v12  ;;  %v1651_v22 = vmul.f32 %v1647_v34, %v1635_v13 }
 0x46d   :  { %2032 = vmatprep.mubr.msk.f32.mxu1 %vm119_vm0, %v1650_v11 }
 0x470   :  { %2033 = vmatmul.mubr.msk.f32.gmra.mrb[8].mxu1 %vm119_vm0, %v1651_v22 }
 0x53f   :  { %v2031_v14 = vpop.f32.mrb[6].mxu1 }
 0x540   :  { %v1745_v53 = vadd.f32 %v2031_v14, %v1954_v31  ;;  %v1739_v54 = vpop.f32.mrb[7].mxu1 }
 0x541   :  { %v1740_v51 = vadd.f32 %v1954_v31, %v1739_v54 }
 0x542   :  { %v1763_v55 = vmul.f32 0.70710677, %v1745_v53  ;;  %v1759_v61 = vmul.f32 0.5, %v1745_v53  ;;  %v1858_v53 = vsub.s32 1, %v2838_v40 }
 0x543   :  { %v1762_v42 = vmul.f32 0.70710677, %v1740_v51  ;;  %v2034_v1 = vpop.f32.mrb[8].mxu1  ;;  %v1758_v24 = vmul.f32 0.5, %v1740_v51 }
 0x544   :  { %2094 = verf.f32 %v1763_v55  ;;  %v1755_v56 = vadd.f32 %v2034_v1, %v1954_v31  ;;  %v1749_v26 = vpop.f32.mrb[9].mxu1 }
 0x545   :  { %2096 = verf.f32 %v1762_v42  ;;  %v1750_v27 = vadd.f32 %v1954_v31, %v1749_v26 }
 0x546   :  { %v1765_v46 = vmul.f32 0.70710677, %v1755_v56  ;;  %v1761_v39 = vmul.f32 0.5, %v1755_v56 }
 0x547   :  { %v1764_v63 = vmul.f32 0.70710677, %v1750_v27  ;;  %v1760_v60 = vmul.f32 0.5, %v1750_v27 }
 0x548   :  { %2098 = verf.f32 %v1765_v46 }
 0x549   :  { %2100 = verf.f32 %v1764_v63 }
 0x54e   :  { %v2095_v38 = vpop.eup %2094 }
 0x54f   :  { %v2097_v52 = vpop.eup %2096  ;;  %v1771_v41 = vadd.f32 1.0, %v2095_v38 }
 0x550   :  { %v1770_v59 = vadd.f32 1.0, %v2097_v52 }
 0x551   :  { %v1775_v0 = vmul.f32 %v1771_v41, %v1759_v61 }
 0x552   :  { %v2099_v50 = vpop.eup %2098  ;;  %v1774_v18 = vmul.f32 %v1770_v59, %v1758_v24 }
 0x553   :  { %v2101_v57 = vpop.eup %2100  ;;  %v1773_v36 = vadd.f32 1.0, %v2099_v50  ;;  %v1786_v29 = vmul.f32 %v1959_v15, %v1775_v0 }
 0x554   :  { %v1772_v28 = vadd.f32 1.0, %v2101_v57  ;;  %v1785_v32 = vmul.f32 %v1959_v15, %v1774_v18 }
 0x555   :  { %v1793_v3 = vsel %vm1789_vm10, %v1786_v29, 0.0  ;;  %v1777_v2 = vmul.f32 %v1773_v36, %v1761_v39 }
 0x556   :  { %1794 = vadd.xlane.f32.xlu0 %v1793_v3  ;;  %v1790_v9 = vsel %vm1789_vm10, %v1785_v32, 0.0  ;;  %v1776_v45 = vmul.f32 %v1772_v28, %v1760_v60 }
 0x557   :  { %1791 = vadd.xlane.f32.xlu1 %v1790_v9  ;;  %v1788_v23 = vmul.f32 %v1959_v15, %v1777_v2 }
 0x558   :  { %v1787_v25 = vmul.f32 %v1959_v15, %v1776_v45 }
 0x559   :  { %v1799_v16 = vsel %vm1789_vm10, %v1788_v23, 0.0 }
 0x55a   :  { %v1796_v4 = vsel %vm1789_vm10, %v1787_v25, 0.0 }
 0x55b   :  { %1797 = vadd.xlane.f32.xlu0 %v1796_v4 }
 0x55f   :  { %1800 = vadd.xlane.f32.xlu0 %v1799_v16 }
 0x568   :  { %1809 = vperm.xlu1 %2068, %v1960_v5  }
 0x5e3   :  { %v1795_v33 = vpop.xlane.xlu0 %1794 }
 0x5e4   :  { %v1792_v7 = vpop.xlane.xlu1 %1791 }
 0x5e8   :  { %v1798_v20 = vpop.xlane.xlu0 %1797  ;;  %v1810_v6 = vpop.permute.xlu1 %1809 }
 0x5e9   :  { %v1812_v62 = vadd.f32 %v1810_v6, %v1792_v7  ;;  %v1813_v10 = vadd.f32 %v1810_v6, %v1795_v33  ;;  %v1814_v58 = vadd.f32 %v1810_v6, %v1798_v20 }
 0x5eb   :  { %v1825_v44 = vrot.slane %v1812_v62, %v1824_v47  ;;  %v1830_v48 = vrot.slane %v1813_v10, %v1829_v37  ;;  %v1836_v30 = vrot.slane %v1814_v58, %v1824_v47 }
 0x5ec   :  { %v1801_v49 = vpop.xlane.xlu0 %1800 }
 0x5ed   :  { %v1815_v35 = vadd.f32 %v1810_v6, %v1801_v49  ;;  %v1832_v19 = vsel %vm1831_vm11, %v1830_v48, %v1825_v44 }
 0x5ef   :  { %v1840_v12 = vrot.slane %v1815_v35, %v1829_v37 }
 0x5f1   :  { %v1841_v34 = vsel %vm1831_vm11, %v1840_v12, %v1836_v30 }
 0x5f2   :  { %v1842_v11 = vsel %vm732_vm1, %v1841_v34, %v1832_v19 }
 0x5f3   :  { %v1845_v13 = vsel %vm1844_vm12, %v1842_v11, inf  ;;  %v1848_v22 = vsel %vm1844_vm12, %v1842_v11, -inf }
 0x5f4   :  { %1846 = vmin.xlane.f32.xlu0 %v1845_v13 }
 0x5f8   :  { %1849 = vmax.xlane.f32.xlu0 %v1848_v22 }
 0x681   :  { %v1847_v17 = vpop.xlane.xlu0 %1846 }
 0x682   :  { %v1855_v42 = vrot.slane %v1847_v17, %v2842_v21  ;;  %v1859_v1 = vrot.slane %v1847_v17, %v1858_v53 }
 0x684   :  { %v1862_v56 = vsub.f32 %v1812_v62, %v1855_v42  ;;  %v1863_v26 = vsub.f32 %v1813_v10, %v1855_v42  ;;  %v1864_v52 = vsub.f32 %v1814_v58, %v1859_v1  ;;  %v1865_v40 = vsub.f32 %v1815_v35, %v1859_v1 }
 0x685   :  { %v1850_v31 = vpop.xlane.xlu0 %1849 }
 0x686   :  { %v1866_v14 = vsub.f32 %v1850_v31, %v1847_v17 }
 0x688   :  { %v1867_v54 = vadd.f32 1e-05, %v1866_v14 }
 0x68a   :  { %v1872_v51 = vrot.slane %v1867_v54, %v2842_v21  ;;  %v1876_v55 = vrot.slane %v1867_v54, %v1858_v53 }
 0x68c   :  { %2102 = vrcp.f32 %v1872_v51 }
 0x68d   :  { %2104 = vrcp.f32 %v1876_v55 }
 0x696   :  { %v2103_v27 = vpop.eup %2102 }
 0x697   :  { %v1881_v46 = vmul.f32 %v2103_v27, %v1863_v26  ;;  %v1880_v63 = vmul.f32 %v2103_v27, %v1862_v56  ;;  %v2105_v38 = vpop.eup %2104 }
 0x698   :  { %v1883_v61 = vmul.f32 %v2105_v38, %v1864_v52  ;;  %v1884_v41 = vmul.f32 %v2105_v38, %v1865_v40 }
 0x699   :  { %1893 = vperm.xlu1 %2068, %v1881_v46   ;;  %1890 = vperm.xlu0 %2069, %v1880_v63  }
 0x69d   :  { %1896 = vperm.xlu1 %2068, %v1883_v61  }
 0x6a1   :  { %1899 = vperm.xlu1 %2068, %v1884_v41  }
 0x718   :  { %v1894_v24 = vpop.permute.xlu1 %1893  ;;  %v1891_v59 = vpop.permute.xlu0 %1890 }
 0x719   :  { %v1908_v0 = vrot.slane %v1894_v24, %v1829_v37  ;;  %v1904_v21 = vrot.slane %v1891_v59, %v1824_v47 }
 0x71b   :  { %v1909_v36 = vsel %vm1831_vm11, %v1908_v0, %v1904_v21 }
 0x71c   :  { %v1897_v15 = vpop.permute.xlu1 %1896 }
 0x71d   :  { %v1913_v18 = vrot.slane %v1897_v15, %v1824_v47 }
 0x720   :  { %v1900_v50 = vpop.permute.xlu1 %1899 }
 0x721   :  { %v1917_v57 = vrot.slane %v1900_v50, %v1829_v37 }
 0x723   :  { %v1918_v29 = vsel %vm1831_vm11, %v1917_v57, %v1913_v18 }
 0x724   :  { %v1919_v39 = vsel %vm732_vm1, %v1918_v29, %v1909_v36 }
 0x725   :  { %1921 = vst.msk [vmem:[#allocation8] sm:$0x3] %vm1844_vm12, %v1919_v39 }
 0x726   :  { %2140 = shalt.err (!%p2137_p12)
}
 0x727   :  { %s2141_s20 = scalar_lea.hbm %s2901_s11, 32 }
 0x728   :  { %p2142_p13 = scmp.ne.s32.totalorder %s2901_s11, %s2141_s20  ;;  %p2145_p0 = scmp.lt.u32.totalorder %s2141_s20, %s2901_s11 }
 0x72a   :  { %p2147_p1 = pnand %p2145_p0, %p2142_p13 }
 0x72c   :  { %2150 = shalt.err (!%p2147_p1)
}
 0x72d   :  { %1931 = dma.vmem_to_hbm [thread:$0]  %s1929_s16, 32, %s2901_s11, [#allocation7]  }
 0x72e   :  { %2153 = dma.done.wait [#allocation7], 32  }
 0x72f   :  { %2154 = vsyncadd [#allocation7], 4294967264 }
 0x730   :  { %1935 = vsyncpa [#allocation6], 1 }
 0x731   :  { %1936 = vsyncpa [#allocation7], 1 }

</bundles_post_ra>
